<compile_context>
chip_gen: v5e
topology: v5e:2x2
jax: 0.10.0
libtpu: 0.0.40
codegen_flags: <defaults>
</compile_context>

<pallas_src>
import jax
import jax.numpy as jnp
from jax import lax
from jax.experimental import pallas as pl
from jax.experimental.pallas import tpu as pltpu


# ----------------------------------------------------------------------------
# Fused conv kernel:  [BN(eval)+ELU] -> conv(KxK, stride, zero-pad) -> [+skip]
# ----------------------------------------------------------------------------
def _make_fused_conv_kernel(*, Hp, Wp, Cin, KH, KW, stride, pad, TO, Wo,
                            couts, act, residual):
    """Ref order: x, [scale, shift], w_0..w_{G-1}, b_0..b_{G-1}, [skip],
                  o_0..o_{G-1}, xp_scratch, acc_0..acc_{G-1}."""
    G = len(couts)
    TIH = (TO - 1) * stride + KH          # input rows needed for one row tile

    def kernel(*refs):
        i = 0
        x_ref = refs[i]; i += 1
        if act:
            s_ref, t_ref = refs[i], refs[i + 1]; i += 2
        w_refs = refs[i:i + G]; i += G
        b_refs = refs[i:i + G]; i += G
        if residual:
            skip_ref = refs[i]; i += 1
        o_refs = refs[i:i + G]; i += G
        xp_ref = refs[i]; i += 1
        acc_refs = refs[i:i + G]

        t_idx = pl.program_id(1)
        r0 = pl.multiple_of(t_idx * (TO * stride), TO * stride)

        # --- prologue: fused BN(eval)+ELU on the input window (halo kept 0) ---
        xw = x_ref[0, pl.ds(r0, TIH), :, :]                   # (TIH, Wp, Cin)
        if act:
            y = xw * s_ref[...] + t_ref[...]
            a = jnp.where(y > 0, y, jnp.exp(jnp.minimum(y, 0.0)) - 1.0)
            if pad > 0:
                # zero-padding must stay zero *after* the activation
                ri = r0 + lax.broadcasted_iota(jnp.int32, (TIH, Wp, Cin), 0)
                ci = lax.broadcasted_iota(jnp.int32, (TIH, Wp, Cin), 1)
                interior = ((ri >= pad) & (ri < Hp - pad) &
                            (ci >= pad) & (ci < Wp - pad))
                a = jnp.where(interior, a, 0.0)
            xp_ref[...] = a
        else:
            xp_ref[...] = xw

        # --- conv: KH*KW shifted-tap MXU matmuls, f32 VMEM accumulator ---
        for kh in range(KH):
            parts = [None] * G
            for kw in range(KW):
                if stride == 1:
                    patch = xp_ref[kh:kh + TO, kw:kw + Wo, :]
                else:
                    # direct strided compute (no full-res conv + subsample)
                    patch = xp_ref[pl.ds(kh, TO, stride),
                                   pl.ds(kw, Wo, stride), :]
                p2 = patch.reshape(TO * Wo, Cin).astype(jnp.bfloat16)
                for g in range(G):
                    d = jnp.dot(p2, w_refs[g][kh * KW + kw],
                                preferred_element_type=jnp.float32)
                    parts[g] = d if parts[g] is None else parts[g] + d
            for g in range(G):
                if kh == 0:
                    acc_refs[g][...] = parts[g]
                else:
                    acc_refs[g][...] += parts[g]

        # --- epilogue: bias, fused residual add, flattened-row store ---
        for g in range(G):
            res = acc_refs[g][...] + b_refs[g][...]
            if residual and g == 0:
                res = res + skip_ref[0]
            o_refs[g][0] = res.astype(o_refs[g].dtype)

    return kernel


def _pick_row_tile(Ho, Wo, max_rows):
    """Largest row tile dividing Ho with a sublane-aligned flattened output."""
    cap = max(1, min(int(max_rows), Ho))
    for d in range(cap, 0, -1):
        if Ho % d == 0 and (d == Ho or (d * Wo) % 8 == 0):
            return d
    return Ho


def fused_conv(x, weights, biases, *, ksize, stride, pad, act=None, skip=None,
               row_tile=None):
    """Fused [BN-eval+ELU] -> conv -> [+residual] layer.

    x       : (N, Hi, Wi, Cin) f32 NHWC
    weights : list of (K*K, Cin, Cout_g) bf16 tap matrices (HWIO tap order)
    biases  : list of (1, Cout_g) f32
    act     : None or (scale, shift) each (1, 1, Cin) f32 -> ELU(x*scale+shift)
    skip    : None or (N, Ho*Wo, Cout_0) f32 residual added to output group 0
    returns : (list of (N, Ho*Wo, Cout_g) f32, Ho, Wo)
    """
    N, Hi, Wi, Cin = x.shape
    KH = KW = ksize
    Hp, Wp = Hi + 2 * pad, Wi + 2 * pad
    Ho = (Hp - KH) // stride + 1
    Wo = (Wp - KW) // stride + 1
    couts = [int(w.shape[-1]) for w in weights]
    G = len(weights)

    if pad:
        x = jnp.pad(x, ((0, 0), (pad, pad), (pad, pad), (0, 0)))

    max_rows = row_tile if row_tile is not None else max(8, 4096 // max(Wo, 1))
    TO = _pick_row_tile(Ho, Wo, max_rows)
    T = Ho // TO
    TIH = (TO - 1) * stride + KH

    in_specs = [pl.BlockSpec((1, Hp, Wp, Cin), lambda n, t: (n, 0, 0, 0))]
    inputs = [x]
    if act is not None:
        scale, shift = act
        in_specs += [pl.BlockSpec((1, 1, Cin), lambda n, t: (0, 0, 0)),
                     pl.BlockSpec((1, 1, Cin), lambda n, t: (0, 0, 0))]
        inputs += [scale, shift]
    for w in weights:
        in_specs.append(pl.BlockSpec(w.shape, lambda n, t: (0, 0, 0)))
        inputs.append(w)
    for b in biases:
        in_specs.append(pl.BlockSpec(b.shape, lambda n, t: (0, 0)))
        inputs.append(b)
    if skip is not None:
        in_specs.append(pl.BlockSpec((1, TO * Wo, couts[0]),
                                     lambda n, t: (n, t, 0)))
        inputs.append(skip)

    out_shape = tuple(jax.ShapeDtypeStruct((N, Ho * Wo, c), jnp.float32)
                      for c in couts)
    out_specs = tuple(pl.BlockSpec((1, TO * Wo, c), lambda n, t: (n, t, 0))
                      for c in couts)
    scratch = [pltpu.VMEM((TIH, Wp, Cin), jnp.float32)]
    scratch += [pltpu.VMEM((TO * Wo, c), jnp.float32) for c in couts]

    # explicit VMEM budget (double-buffered blocks + weights + scratch)
    est = 2 * Hp * Wp * Cin * 4
    est += 2 * sum(TO * Wo * c * 4 for c in couts)
    if skip is not None:
        est += 2 * TO * Wo * couts[0] * 4
    est += 2 * sum(int(w.size) * 2 + int(b.size) * 4
                   for w, b in zip(weights, biases))
    est += TIH * Wp * Cin * 4 + sum(TO * Wo * c * 4 for c in couts)
    vmem_limit = int(min(max(32 * 2 ** 20, 3 * est), 48 * 2 ** 20))

    kernel = _make_fused_conv_kernel(
        Hp=Hp, Wp=Wp, Cin=Cin, KH=KH, KW=KW, stride=stride, pad=pad,
        TO=TO, Wo=Wo, couts=couts, act=act is not None,
        residual=skip is not None)

    outs = pl.pallas_call(
        kernel,
        out_shape=out_shape,
        grid=(N, T),
        in_specs=in_specs,
        out_specs=out_specs,
        scratch_shapes=scratch,
        compiler_params=pltpu.CompilerParams(
            dimension_semantics=("parallel", "parallel"),
            vmem_limit_bytes=vmem_limit),
    )(*inputs)
    if not isinstance(outs, (tuple, list)):
        outs = (outs,)
    return list(outs), Ho, Wo


# ----------------------------------------------------------------------------
# Deterministic parameter construction (mirrors the PyTorch module's __init__)
# ----------------------------------------------------------------------------
def _init_bn(key, c):
    k1, k2, k3, k4 = jax.random.split(key, 4)
    gamma = 1.0 + 0.1 * jax.random.normal(k1, (c,), jnp.float32)
    beta = 0.1 * jax.random.normal(k2, (c,), jnp.float32)
    mean = 0.1 * jax.random.normal(k3, (c,), jnp.float32)
    var = jax.random.uniform(k4, (c,), jnp.float32, 0.5, 1.5)
    return gamma, beta, mean, var


def _fuse_conv_bn(w_oihw, bn, eps=1e-5):
    g, b, m, v = bn
    t = g / jnp.sqrt(v + eps)
    return w_oihw * t[:, None, None, None], b - m * t


def _init_reparam(key, cin, cout, ksize):
    # ReparamConvBlock (deploy=False) in eval mode == one fused conv+bias
    # (identical math to switch_to_deploy).  branch_identity never fires in
    # the Encoder (in_channels != out_channels / stride 2 everywhere).
    k1, k2, k3, k4 = jax.random.split(key, 4)
    w3 = jax.random.normal(k1, (cout, cin, ksize, ksize), jnp.float32) / jnp.sqrt(cin * ksize * ksize)
    bn3 = _init_bn(k2, cout)
    w1 = jax.random.normal(k3, (cout, cin, 1, 1), jnp.float32) / jnp.sqrt(cin)
    bn1 = _init_bn(k4, cout)
    k3f, b3f = _fuse_conv_bn(w3, bn3)
    k1f, b1f = _fuse_conv_bn(w1, bn1)
    p = ksize // 2
    k1p = jnp.pad(k1f, ((0, 0), (0, 0), (p, p), (p, p)))
    kernel_oihw = k3f + k1p
    bias = b3f + b1f
    w_hwio = jnp.transpose(kernel_oihw, (2, 3, 1, 0))          # (KH,KW,Cin,Cout)
    w_taps = w_hwio.reshape(ksize * ksize, cin, cout).astype(jnp.bfloat16)
    return w_taps, bias.reshape(1, cout).astype(jnp.float32)


def _init_norm(key, c, eps=1e-4):
    # get_norm_layer('bn'): BatchNorm2d(c, eps=1e-4) in eval = per-channel affine
    g, b, m, v = _init_bn(key, c)
    scale = g / jnp.sqrt(v + eps)
    shift = b - m * scale
    return (scale.reshape(1, 1, c).astype(jnp.float32),
            shift.reshape(1, 1, c).astype(jnp.float32))


def build_encoder_params(key, channels, ch, blocks, latent_channels, num_res_blocks):
    keys = iter(jax.random.split(key, 64))
    params = {"conv_in": _init_reparam(next(keys), channels, blocks[0] * ch, 3)}

    widths_in = list(blocks)
    widths_out = list(blocks[1:]) + [2 * blocks[-1]]
    layers = []
    for w_in, w_out in zip(widths_in, widths_out):             # ResDown blocks
        cin, cout = w_in * ch, w_out * ch
        mid = cout // 2
        n1 = _init_norm(next(keys), cin)
        w1, b1 = _init_reparam(next(keys), cin, mid + cout, 3)
        n2 = _init_norm(next(keys), mid)
        w2b2 = _init_reparam(next(keys), mid, cout, 3)
        layers.append(dict(
            kind="down", n1=n1,
            w1s=w1[:, :, :cout], b1s=b1[:, :cout],             # skip channels
            w1h=w1[:, :, cout:], b1h=b1[:, cout:],             # bottleneck chans
            n2=n2, w2b2=w2b2))
    cfin = widths_out[-1] * ch
    for _ in range(num_res_blocks):                            # trailing ResBlocks
        bttl = cfin // 2
        n1 = _init_norm(next(keys), cfin)
        w1b1 = _init_reparam(next(keys), cfin, bttl, 3)        # in==out -> skip=True
        n2 = _init_norm(next(keys), bttl)
        w2b2 = _init_reparam(next(keys), bttl, cfin, 3)
        layers.append(dict(kind="res", n1=n1, w1b1=w1b1, n2=n2, w2b2=w2b2))
    params["layers"] = layers
    params["conv_mu"] = _init_reparam(next(keys), cfin, latent_channels, 1)
    params["conv_log_var"] = _init_reparam(next(keys), cfin, latent_channels, 1)
    return params


# ----------------------------------------------------------------------------
# Encoder forward (glue around the fused Pallas conv kernels)
# ----------------------------------------------------------------------------
def encoder_forward(params, x_nchw, row_tile=None):
    x = jnp.transpose(x_nchw, (0, 2, 3, 1)).astype(jnp.float32)   # NCHW -> NHWC
    N = x.shape[0]

    w, b = params["conv_in"]
    (out,), Ho, Wo = fused_conv(x, [w], [b], ksize=3, stride=1, pad=1,
                                row_tile=row_tile)
    x = out.reshape(N, Ho, Wo, -1)

    for p in params["layers"]:
        if p["kind"] == "down":
            # ResDown: ELU(BN1(x)) -> stride-2 conv -> (skip || h);
            #          ELU(BN2(h)) -> conv -> + skip        (two fused kernels)
            outs, Ho, Wo = fused_conv(
                x, [p["w1s"], p["w1h"]], [p["b1s"], p["b1h"]],
                ksize=3, stride=2, pad=1, act=p["n1"], row_tile=row_tile)
            skip_f, h_f = outs
            h = h_f.reshape(N, Ho, Wo, -1)
            w2, b2 = p["w2b2"]
            (out,), Ho, Wo = fused_conv(h, [w2], [b2], ksize=3, stride=1, pad=1,
                                        act=p["n2"], skip=skip_f,
                                        row_tile=row_tile)
            x = out.reshape(N, Ho, Wo, -1)
        else:
            # ResBlock (channel_in == channel_out -> residual = x_in)
            Hc, Wc, Cc = x.shape[1], x.shape[2], x.shape[3]
            x_in_flat = x.reshape(N, Hc * Wc, Cc)
            w1, b1 = p["w1b1"]
            (h_f,), Ho, Wo = fused_conv(x, [w1], [b1], ksize=3, stride=1, pad=1,
                                        act=p["n1"], row_tile=row_tile)
            h = h_f.reshape(N, Ho, Wo, -1)
            w2, b2 = p["w2b2"]
            (out,), Ho, Wo = fused_conv(h, [w2], [b2], ksize=3, stride=1, pad=1,
                                        act=p["n2"], skip=x_in_flat,
                                        row_tile=row_tile)
            x = out.reshape(N, Ho, Wo, -1)

    # final ELU fused (scale=1, shift=0) into the merged mu/log_var 1x1 head
    C = x.shape[-1]
    ident = (jnp.ones((1, 1, C), jnp.float32), jnp.zeros((1, 1, C), jnp.float32))
    w_mu, b_mu = params["conv_mu"]
    w_lv, b_lv = params["conv_log_var"]
    (mu_f, lv_f), Ho, Wo = fused_conv(x, [w_mu, w_lv], [b_mu, b_lv],
                                      ksize=1, stride=1, pad=0, act=ident,
                                      row_tile=row_tile)
    mu = mu_f.reshape(N, Ho, Wo, -1)
    log_var = lv_f.reshape(N, Ho, Wo, -1)

    # eval mode, sample=False  ->  x = mu
    # TODO(synk): training-mode stochastic sampling (torch.randn_like) not
    #             implemented; would use pltpu.prng_seed / pltpu.stateful_normal.
    to_nchw = lambda a: jnp.transpose(a, (0, 3, 1, 2))
    return to_nchw(mu), to_nchw(mu), to_nchw(log_var)


# ----------------------------------------------------------------------------
# Pure-JAX reference (lax.conv) with the kernel's bf16 operand rounding
# ----------------------------------------------------------------------------
def _ref_conv(a, w_taps, b, ksize, stride, pad):
    w = w_taps.astype(jnp.float32).reshape(ksize, ksize,
                                           w_taps.shape[1], w_taps.shape[2])
    a = a.astype(jnp.bfloat16).astype(jnp.float32)
    out = lax.conv_general_dilated(
        a, w, window_strides=(stride, stride),
        padding=[(pad, pad), (pad, pad)],
        dimension_numbers=("NHWC", "HWIO", "NHWC"),
        preferred_element_type=jnp.float32)
    return out + b.reshape(1, 1, 1, -1)


def _ref_act(a, norm):
    s, t = norm
    y = a * s.reshape(1, 1, 1, -1) + t.reshape(1, 1, 1, -1)
    return jnp.where(y > 0, y, jnp.exp(jnp.minimum(y, 0.0)) - 1.0)


def reference_forward(params, x_nchw):
    x = jnp.transpose(x_nchw, (0, 2, 3, 1)).astype(jnp.float32)
    w, b = params["conv_in"]
    x = _ref_conv(x, w, b, 3, 1, 1)
    for p in params["layers"]:
        if p["kind"] == "down":
            a = _ref_act(x, p["n1"])
            skip = _ref_conv(a, p["w1s"], p["b1s"], 3, 2, 1)
            h = _ref_conv(a, p["w1h"], p["b1h"], 3, 2, 1)
            h = _ref_act(h, p["n2"])
            w2, b2 = p["w2b2"]
            x = _ref_conv(h, w2, b2, 3, 1, 1) + skip
        else:
            a = _ref_act(x, p["n1"])
            w1, b1 = p["w1b1"]
            h = _ref_conv(a, w1, b1, 3, 1, 1)
            h = _ref_act(h, p["n2"])
            w2, b2 = p["w2b2"]
            x = _ref_conv(h, w2, b2, 3, 1, 1) + x
    a = jnp.where(x > 0, x, jnp.exp(jnp.minimum(x, 0.0)) - 1.0)
    w_mu, b_mu = params["conv_mu"]
    w_lv, b_lv = params["conv_log_var"]
    mu = _ref_conv(a, w_mu, b_mu, 1, 1, 0)
    lv = _ref_conv(a, w_lv, b_lv, 1, 1, 0)
    to_nchw = lambda t_: jnp.transpose(t_, (0, 3, 1, 2))
    return to_nchw(mu), to_nchw(mu), to_nchw(lv)


# ----------------------------------------------------------------------------
if __name__ == "__main__":
    key = jax.random.PRNGKey(0)
    k_x, k_p = jax.random.split(key)

    # small config: channels=4, ch=8, blocks=(1,2), latent=16, num_res_blocks=1
    channels, ch, blocks, latent, n_res = 4, 8, (1, 2), 16, 1
    N, H, W = 2, 32, 32

    x = jax.random.normal(k_x, (N, channels, H, W), jnp.float32)
    params = build_encoder_params(k_p, channels, ch, blocks, latent, n_res)

    # row_tile=8 exercises both the multi-row-tile and single-tile grid paths
    z, mu, log_var = encoder_forward(params, x, row_tile=8)
    jax.block_until_ready((z, mu, log_var))

    assert z.shape == (N, latent, H // 4, W // 4)
    assert mu.shape == log_var.shape == z.shape

    # structural correctness vs a pure-JAX reference (same bf16 operand rounding)
    z_r, mu_r, lv_r = reference_forward(params, x)

    def _maxrel(a, b):
        return float(jnp.max(jnp.abs(a - b)) / (jnp.max(jnp.abs(b)) + 1e-6))

    assert _maxrel(mu, mu_r) < 1e-2, ("mu mismatch", _maxrel(mu, mu_r))
    assert _maxrel(log_var, lv_r) < 1e-2, ("log_var mismatch", _maxrel(log_var, lv_r))

    print("KERNEL_OK")
</pallas_src>

<mosaic_0001>
module attributes {stable_mosaic.version = 11 : i64} {
  func.func @kernel(%arg0: i32, %arg1: i32, %arg2: memref<1x34x34x4xf32, #tpu.memory_space<vmem>>, %arg3: memref<9x4x8xbf16, #tpu.memory_space<vmem>>, %arg4: memref<1x8xf32, #tpu.memory_space<vmem>>, %arg5: memref<1x256x8xf32, #tpu.memory_space<vmem>>, %arg6: memref<10x34x4xf32, #tpu.memory_space<vmem>>, %arg7: memref<256x8xf32, #tpu.memory_space<vmem>>) attributes {dimension_semantics = [#tpu.dimension_semantics<parallel>, #tpu.dimension_semantics<parallel>], iteration_bounds = array<i64: 2, 4>, scalar_prefetch = 0 : i64, scratch_operands = 2 : i64, tpu.core_type = #tpu.core_type<tc>, window_params = [{transform_indices = @transform_0, window_bounds = array<i64: 1, 34, 34, 4>}, {pipeline_mode = #tpu.pipeline_mode<synchronous>, transform_indices = @transform_1, window_bounds = array<i64: 9, 4, 8>}, {pipeline_mode = #tpu.pipeline_mode<synchronous>, transform_indices = @transform_2, window_bounds = array<i64: 1, 8>}, {transform_indices = @transform_3, window_bounds = array<i64: 1, 256, 8>}]} {
    %c8_i32 = arith.constant 8 : i32
    %0 = arith.muli %arg1, %c8_i32 : i32
    %1 = tpu.assume_multiple %0, 8 : i32
    %c0 = arith.constant 0 : index
    %2 = arith.index_cast %1 : i32 to index
    %c0_0 = arith.constant 0 : index
    %c0_1 = arith.constant 0 : index
    %3 = vector.load %arg2[%c0, %2, %c0_0, %c0_1] : memref<1x34x34x4xf32, #tpu.memory_space<vmem>>, vector<1x10x34x4xf32>
    %4 = vector.shape_cast %3 : vector<1x10x34x4xf32> to vector<10x34x4xf32>
    %c0_2 = arith.constant 0 : index
    %c0_3 = arith.constant 0 : index
    %c0_4 = arith.constant 0 : index
    %5 = vector.load %arg6[%c0_2, %c0_3, %c0_4] : memref<10x34x4xf32, #tpu.memory_space<vmem>>, vector<10x34x4xf32>
    tpu.vector_store %arg6[%c0_2, %c0_3, %c0_4], %4 {strides = array<i32>} : memref<10x34x4xf32, #tpu.memory_space<vmem>>, vector<10x34x4xf32>,
    %c0_5 = arith.constant 0 : index
    %c0_6 = arith.constant 0 : index
    %c0_7 = arith.constant 0 : index
    %6 = vector.load %arg6[%c0_5, %c0_6, %c0_7] : memref<10x34x4xf32, #tpu.memory_space<vmem>>, vector<8x32x4xf32>
    %7 = vector.shape_cast %6 : vector<8x32x4xf32> to vector<256x4xf32>
    %8 = arith.truncf %7 : vector<256x4xf32> to vector<256x4xbf16>
    %c0_8 = arith.constant 0 : index
    %c0_9 = arith.constant 0 : index
    %c0_10 = arith.constant 0 : index
    %9 = vector.load %arg3[%c0_8, %c0_9, %c0_10] : memref<9x4x8xbf16, #tpu.memory_space<vmem>>, vector<1x4x8xbf16>
    %10 = vector.shape_cast %9 : vector<1x4x8xbf16> to vector<4x8xbf16>
    %cst = arith.constant dense<0.000000e+00> : vector<256x8xf32>
    %11 = tpu.matmul %8, %10, %cst {dimension_numbers = #tpu.dot_dimension_numbers<[1], [0], [0], [1], [0, 0, 1, 1], [], []>} : vector<256x4xbf16>, vector<4x8xbf16>, vector<256x8xf32> -> vector<256x8xf32>
    %c0_11 = arith.constant 0 : index
    %c1 = arith.constant 1 : index
    %c0_12 = arith.constant 0 : index
    %12 = vector.load %arg6[%c0_11, %c1, %c0_12] : memref<10x34x4xf32, #tpu.memory_space<vmem>>, vector<8x32x4xf32>
    %13 = vector.shape_cast %12 : vector<8x32x4xf32> to vector<256x4xf32>
    %14 = arith.truncf %13 : vector<256x4xf32> to vector<256x4xbf16>
    %c1_13 = arith.constant 1 : index
    %c0_14 = arith.constant 0 : index
    %c0_15 = arith.constant 0 : index
    %15 = vector.load %arg3[%c1_13, %c0_14, %c0_15] : memref<9x4x8xbf16, #tpu.memory_space<vmem>>, vector<1x4x8xbf16>
    %16 = vector.shape_cast %15 : vector<1x4x8xbf16> to vector<4x8xbf16>
    %cst_16 = arith.constant dense<0.000000e+00> : vector<256x8xf32>
    %17 = tpu.matmul %14, %16, %cst_16 {dimension_numbers = #tpu.dot_dimension_numbers<[1], [0], [0], [1], [0, 0, 1, 1], [], []>} : vector<256x4xbf16>, vector<4x8xbf16>, vector<256x8xf32> -> vector<256x8xf32>
    %18 = arith.addf %11, %17 : vector<256x8xf32>
    %c0_17 = arith.constant 0 : index
    %c2 = arith.constant 2 : index
    %c0_18 = arith.constant 0 : index
    %19 = vector.load %arg6[%c0_17, %c2, %c0_18] : memref<10x34x4xf32, #tpu.memory_space<vmem>>, vector<8x32x4xf32>
    %20 = vector.shape_cast %19 : vector<8x32x4xf32> to vector<256x4xf32>
    %21 = arith.truncf %20 : vector<256x4xf32> to vector<256x4xbf16>
    %c2_19 = arith.constant 2 : index
    %c0_20 = arith.constant 0 : index
    %c0_21 = arith.constant 0 : index
    %22 = vector.load %arg3[%c2_19, %c0_20, %c0_21] : memref<9x4x8xbf16, #tpu.memory_space<vmem>>, vector<1x4x8xbf16>
    %23 = vector.shape_cast %22 : vector<1x4x8xbf16> to vector<4x8xbf16>
    %cst_22 = arith.constant dense<0.000000e+00> : vector<256x8xf32>
    %24 = tpu.matmul %21, %23, %cst_22 {dimension_numbers = #tpu.dot_dimension_numbers<[1], [0], [0], [1], [0, 0, 1, 1], [], []>} : vector<256x4xbf16>, vector<4x8xbf16>, vector<256x8xf32> -> vector<256x8xf32>
    %25 = arith.addf %18, %24 : vector<256x8xf32>
    %c0_23 = arith.constant 0 : index
    %c0_24 = arith.constant 0 : index
    %26 = vector.load %arg7[%c0_23, %c0_24] : memref<256x8xf32, #tpu.memory_space<vmem>>, vector<256x8xf32>
    tpu.vector_store %arg7[%c0_23, %c0_24], %25 {strides = array<i32>} : memref<256x8xf32, #tpu.memory_space<vmem>>, vector<256x8xf32>,
    %c1_25 = arith.constant 1 : index
    %c0_26 = arith.constant 0 : index
    %c0_27 = arith.constant 0 : index
    %27 = vector.load %arg6[%c1_25, %c0_26, %c0_27] : memref<10x34x4xf32, #tpu.memory_space<vmem>>, vector<8x32x4xf32>
    %28 = vector.shape_cast %27 : vector<8x32x4xf32> to vector<256x4xf32>
    %29 = arith.truncf %28 : vector<256x4xf32> to vector<256x4xbf16>
    %c3 = arith.constant 3 : index
    %c0_28 = arith.constant 0 : index
    %c0_29 = arith.constant 0 : index
    %30 = vector.load %arg3[%c3, %c0_28, %c0_29] : memref<9x4x8xbf16, #tpu.memory_space<vmem>>, vector<1x4x8xbf16>
    %31 = vector.shape_cast %30 : vector<1x4x8xbf16> to vector<4x8xbf16>
    %cst_30 = arith.constant dense<0.000000e+00> : vector<256x8xf32>
    %32 = tpu.matmul %29, %31, %cst_30 {dimension_numbers = #tpu.dot_dimension_numbers<[1], [0], [0], [1], [0, 0, 1, 1], [], []>} : vector<256x4xbf16>, vector<4x8xbf16>, vector<256x8xf32> -> vector<256x8xf32>
    %c1_31 = arith.constant 1 : index
    %c1_32 = arith.constant 1 : index
    %c0_33 = arith.constant 0 : index
    %33 = vector.load %arg6[%c1_31, %c1_32, %c0_33] : memref<10x34x4xf32, #tpu.memory_space<vmem>>, vector<8x32x4xf32>
    %34 = vector.shape_cast %33 : vector<8x32x4xf32> to vector<256x4xf32>
    %35 = arith.truncf %34 : vector<256x4xf32> to vector<256x4xbf16>
    %c4 = arith.constant 4 : index
    %c0_34 = arith.constant 0 : index
    %c0_35 = arith.constant 0 : index
    %36 = vector.load %arg3[%c4, %c0_34, %c0_35] : memref<9x4x8xbf16, #tpu.memory_space<vmem>>, vector<1x4x8xbf16>
    %37 = vector.shape_cast %36 : vector<1x4x8xbf16> to vector<4x8xbf16>
    %cst_36 = arith.constant dense<0.000000e+00> : vector<256x8xf32>
    %38 = tpu.matmul %35, %37, %cst_36 {dimension_numbers = #tpu.dot_dimension_numbers<[1], [0], [0], [1], [0, 0, 1, 1], [], []>} : vector<256x4xbf16>, vector<4x8xbf16>, vector<256x8xf32> -> vector<256x8xf32>
    %39 = arith.addf %32, %38 : vector<256x8xf32>
    %c1_37 = arith.constant 1 : index
    %c2_38 = arith.constant 2 : index
    %c0_39 = arith.constant 0 : index
    %40 = vector.load %arg6[%c1_37, %c2_38, %c0_39] : memref<10x34x4xf32, #tpu.memory_space<vmem>>, vector<8x32x4xf32>
    %41 = vector.shape_cast %40 : vector<8x32x4xf32> to vector<256x4xf32>
    %42 = arith.truncf %41 : vector<256x4xf32> to vector<256x4xbf16>
    %c5 = arith.constant 5 : index
    %c0_40 = arith.constant 0 : index
    %c0_41 = arith.constant 0 : index
    %43 = vector.load %arg3[%c5, %c0_40, %c0_41] : memref<9x4x8xbf16, #tpu.memory_space<vmem>>, vector<1x4x8xbf16>
    %44 = vector.shape_cast %43 : vector<1x4x8xbf16> to vector<4x8xbf16>
    %cst_42 = arith.constant dense<0.000000e+00> : vector<256x8xf32>
    %45 = tpu.matmul %42, %44, %cst_42 {dimension_numbers = #tpu.dot_dimension_numbers<[1], [0], [0], [1], [0, 0, 1, 1], [], []>} : vector<256x4xbf16>, vector<4x8xbf16>, vector<256x8xf32> -> vector<256x8xf32>
    %46 = arith.addf %39, %45 : vector<256x8xf32>
    %c0_43 = arith.constant 0 : index
    %c0_44 = arith.constant 0 : index
    %47 = vector.load %arg7[%c0_43, %c0_44] : memref<256x8xf32, #tpu.memory_space<vmem>>, vector<256x8xf32>
    %48 = arith.addf %47, %46 : vector<256x8xf32>
    %c0_45 = arith.constant 0 : index
    %c0_46 = arith.constant 0 : index
    %49 = vector.load %arg7[%c0_45, %c0_46] : memref<256x8xf32, #tpu.memory_space<vmem>>, vector<256x8xf32>
    tpu.vector_store %arg7[%c0_45, %c0_46], %48 {strides = array<i32>} : memref<256x8xf32, #tpu.memory_space<vmem>>, vector<256x8xf32>,
    %c2_47 = arith.constant 2 : index
    %c0_48 = arith.constant 0 : index
    %c0_49 = arith.constant 0 : index
    %50 = vector.load %arg6[%c2_47, %c0_48, %c0_49] : memref<10x34x4xf32, #tpu.memory_space<vmem>>, vector<8x32x4xf32>
    %51 = vector.shape_cast %50 : vector<8x32x4xf32> to vector<256x4xf32>
    %52 = arith.truncf %51 : vector<256x4xf32> to vector<256x4xbf16>
    %c6 = arith.constant 6 : index
    %c0_50 = arith.constant 0 : index
    %c0_51 = arith.constant 0 : index
    %53 = vector.load %arg3[%c6, %c0_50, %c0_51] : memref<9x4x8xbf16, #tpu.memory_space<vmem>>, vector<1x4x8xbf16>
    %54 = vector.shape_cast %53 : vector<1x4x8xbf16> to vector<4x8xbf16>
    %cst_52 = arith.constant dense<0.000000e+00> : vector<256x8xf32>
    %55 = tpu.matmul %52, %54, %cst_52 {dimension_numbers = #tpu.dot_dimension_numbers<[1], [0], [0], [1], [0, 0, 1, 1], [], []>} : vector<256x4xbf16>, vector<4x8xbf16>, vector<256x8xf32> -> vector<256x8xf32>
    %c2_53 = arith.constant 2 : index
    %c1_54 = arith.constant 1 : index
    %c0_55 = arith.constant 0 : index
    %56 = vector.load %arg6[%c2_53, %c1_54, %c0_55] : memref<10x34x4xf32, #tpu.memory_space<vmem>>, vector<8x32x4xf32>
    %57 = vector.shape_cast %56 : vector<8x32x4xf32> to vector<256x4xf32>
    %58 = arith.truncf %57 : vector<256x4xf32> to vector<256x4xbf16>
    %c7 = arith.constant 7 : index
    %c0_56 = arith.constant 0 : index
    %c0_57 = arith.constant 0 : index
    %59 = vector.load %arg3[%c7, %c0_56, %c0_57] : memref<9x4x8xbf16, #tpu.memory_space<vmem>>, vector<1x4x8xbf16>
    %60 = vector.shape_cast %59 : vector<1x4x8xbf16> to vector<4x8xbf16>
    %cst_58 = arith.constant dense<0.000000e+00> : vector<256x8xf32>
    %61 = tpu.matmul %58, %60, %cst_58 {dimension_numbers = #tpu.dot_dimension_numbers<[1], [0], [0], [1], [0, 0, 1, 1], [], []>} : vector<256x4xbf16>, vector<4x8xbf16>, vector<256x8xf32> -> vector<256x8xf32>
    %62 = arith.addf %55, %61 : vector<256x8xf32>
    %c2_59 = arith.constant 2 : index
    %c2_60 = arith.constant 2 : index
    %c0_61 = arith.constant 0 : index
    %63 = vector.load %arg6[%c2_59, %c2_60, %c0_61] : memref<10x34x4xf32, #tpu.memory_space<vmem>>, vector<8x32x4xf32>
    %64 = vector.shape_cast %63 : vector<8x32x4xf32> to vector<256x4xf32>
    %65 = arith.truncf %64 : vector<256x4xf32> to vector<256x4xbf16>
    %c8 = arith.constant 8 : index
    %c0_62 = arith.constant 0 : index
    %c0_63 = arith.constant 0 : index
    %66 = vector.load %arg3[%c8, %c0_62, %c0_63] : memref<9x4x8xbf16, #tpu.memory_space<vmem>>, vector<1x4x8xbf16>
    %67 = vector.shape_cast %66 : vector<1x4x8xbf16> to vector<4x8xbf16>
    %cst_64 = arith.constant dense<0.000000e+00> : vector<256x8xf32>
    %68 = tpu.matmul %65, %67, %cst_64 {dimension_numbers = #tpu.dot_dimension_numbers<[1], [0], [0], [1], [0, 0, 1, 1], [], []>} : vector<256x4xbf16>, vector<4x8xbf16>, vector<256x8xf32> -> vector<256x8xf32>
    %69 = arith.addf %62, %68 : vector<256x8xf32>
    %c0_65 = arith.constant 0 : index
    %c0_66 = arith.constant 0 : index
    %70 = vector.load %arg7[%c0_65, %c0_66] : memref<256x8xf32, #tpu.memory_space<vmem>>, vector<256x8xf32>
    %71 = arith.addf %70, %69 : vector<256x8xf32>
    %c0_67 = arith.constant 0 : index
    %c0_68 = arith.constant 0 : index
    %72 = vector.load %arg7[%c0_67, %c0_68] : memref<256x8xf32, #tpu.memory_space<vmem>>, vector<256x8xf32>
    tpu.vector_store %arg7[%c0_67, %c0_68], %71 {strides = array<i32>} : memref<256x8xf32, #tpu.memory_space<vmem>>, vector<256x8xf32>,
    %c0_69 = arith.constant 0 : index
    %c0_70 = arith.constant 0 : index
    %73 = vector.load %arg7[%c0_69, %c0_70] : memref<256x8xf32, #tpu.memory_space<vmem>>, vector<256x8xf32>
    %c0_71 = arith.constant 0 : index
    %c0_72 = arith.constant 0 : index
    %74 = vector.load %arg4[%c0_71, %c0_72] : memref<1x8xf32, #tpu.memory_space<vmem>>, vector<1x8xf32>
    %75 = vector.broadcast %74 : vector<1x8xf32> to vector<256x8xf32>
    %76 = arith.addf %73, %75 : vector<256x8xf32>
    %c0_73 = arith.constant 0 : index
    %c0_74 = arith.constant 0 : index
    %c0_75 = arith.constant 0 : index
    %77 = vector.load %arg5[%c0_73, %c0_74, %c0_75] : memref<1x256x8xf32, #tpu.memory_space<vmem>>, vector<1x256x8xf32>
    %78 = vector.shape_cast %77 : vector<1x256x8xf32> to vector<256x8xf32>
    %79 = vector.shape_cast %76 : vector<256x8xf32> to vector<1x256x8xf32>
    tpu.vector_store %arg5[%c0_73, %c0_74, %c0_75], %79 {strides = array<i32>} : memref<1x256x8xf32, #tpu.memory_space<vmem>>, vector<1x256x8xf32>,
    return
  }
  func.func @transform_0(%arg0: i32, %arg1: i32) -> (i32, i32, i32, i32) {
    %c0_i32 = arith.constant 0 : i32
    %c0_i32_0 = arith.constant 0 : i32
    %c0_i32_1 = arith.constant 0 : i32
    %c0_i32_2 = arith.constant 0 : i32
    return %arg0, %c0_i32, %c0_i32_0, %c0_i32_1 : i32, i32, i32, i32
  }
  func.func @transform_1(%arg0: i32, %arg1: i32) -> (i32, i32, i32) {
    %c0_i32 = arith.constant 0 : i32
    %c0_i32_0 = arith.constant 0 : i32
    %c0_i32_1 = arith.constant 0 : i32
    %c0_i32_2 = arith.constant 0 : i32
    return %c0_i32, %c0_i32_0, %c0_i32_1 : i32, i32, i32
  }
  func.func @transform_2(%arg0: i32, %arg1: i32) -> (i32, i32) {
    %c0_i32 = arith.constant 0 : i32
    %c0_i32_0 = arith.constant 0 : i32
    %c0_i32_1 = arith.constant 0 : i32
    return %c0_i32, %c0_i32_0 : i32, i32
  }
  func.func @transform_3(%arg0: i32, %arg1: i32) -> (i32, i32, i32) {
    %c0_i32 = arith.constant 0 : i32
    %c0_i32_0 = arith.constant 0 : i32
    return %arg0, %arg1, %c0_i32 : i32, i32, i32
  }
}

</mosaic_0001>

<bundles_post_ra>
// kernel: tpu_custom_call.1
= control target key start
LH: loop header
LB: loop body
LE: loop exit
PB: predicated region body
PF: predicated region fallthrough
CT: control target
= control target key end

     0   :  { %s2790_s12 = smov 0   ;;  %s2792_s13 = smov 0   ;;  %s3695_s0 = inlined_call_operand.vmem [shape: f32[2,34,34,4], index: 0, kind: input, shape index: {}]   ;;  %s3696_s1 = inlined_call_operand.vmem [shape: bf16[9,4,8], index: 1, kind: input, shape index: {}]   ;;  %s3697_s2 = inlined_call_operand.vmem [shape: f32[1,8], index: 2, kind: input, shape index: {}]   ;;  %s3698_s3 = inlined_call_operand.vmem [shape: f32[2,1024,8], index: 3, kind: output, shape index: {}]  }
   0x1   :  { %s2794_s14 = smov 0   ;;  %s2796_s15 = smov 0  }
   0x2   :  { %s2798_s16 = smov 0  }
   0x3 LB: > { %s22_s17 = sadd.s32 1, %s2760_s14  ;;  %s25_s18 = sadd.s32 1, %s2764_s15  ;;  %s2768_s16 = sphi %s2798_s16, %s13_s16   ;;  %s2764_s15 = sphi %s2796_s15, %s3722_s15   ;;  %s2760_s14 = sphi %s2794_s14, %s3721_s14   ;;  %s2756_s13 = sphi %s2792_s13, %s3720_s13   ;;  %s2752_s12 = sphi %s2790_s12, %s3719_s12  }
   0x4   : > { %p23_p0 = scmp.ge.s32.totalorder %s22_s17, 4  ;;  %p2523_p1 = scmp.ge.s32.totalorder %s2768_s16, 1 }
   0x5   : > { %p151_p2 = scmp.lt.s32.totalorder %s2768_s16, 9 }
   0x6   : > { %s3724_s17 = smov (%p23_p0, %s22_s17), 0  ;;  %s3726_s18 = smov (!%p23_p0, %s25_s18), %s2764_s15 }
   0x7   : > { %p152_p3 = pnand %p2523_p1, %p151_p2  ;;  %p27_p4 = scmp.ge.s32.totalorder %s3726_s18, 2 }
   0x9   : > { %s3728_s18 = smov (%p27_p4, %s3726_s18), 0  ;;  %155 = sbr.rel (%p152_p3) target bundleno = 757 (0x2f5), region = 32 }
   0xe   : > { %v2530_v0 = vld [vmem:[%s3696_s1 + $0x2] sm:$0x3]  ;;  %vm447_vm0 = vcmask 1041408   ;;  %p179_p5 = scmp.lt.s32.totalorder %s2756_s13, 1  ;;  %v348_v2 = vld [vmem:[%s3696_s1] sm:$0x3] }
   0xf   : > { %v449_v1 = vsel %vm447_vm0, %v2530_v0, 0  ;;  %v2563_v3 = vld [vmem:[%s3696_s1 + $0x4] sm:$0x3]  ;;  %v589_v4 = vsel %vm447_vm0, %v348_v2, 0  ;;  %v2581_v6 = vld [vmem:[%s3696_s1 + $0x8] sm:$0x3] }
  0x10   : > { %2684 = vmatpush.bf16.msra.mxu1 %v449_v1  ;;  %2685 = vmatpush.bf16.msra.mxu2 %v449_v1  ;;  %s3730_s13 = smov (!%p179_p5, %s2756_s13), 1  ;;  %v779_v5 = vsel %vm447_vm0, %v2563_v3, 0  ;;  %s2529_s27 = smul.u32 320, %s2752_s12  ;;  %v1085_v7 = vsel %vm447_vm0, %v2581_v6, 0  ;;  %v2580_v8 = vld [vmem:[%s3696_s1 + $0x6] sm:$0x3] }
  0x11   : > { %2686 = vmatpush.bf16.msra.mxu3 %v449_v1  ;;  %458 = vmatpush.bf16.msra.mxu0 %v449_v1  ;;  %s2687_s30 = smul.u32 1360, %s3730_s13  ;;  %v1225_v9 = vsel %vm447_vm0, %v2580_v8, 0  ;;  %vm248_vm1 = vcmask 31744   ;;  %vm253_vm2 = vcmask 25600   ;;  %vm902_vm3 = vcmask 64512   ;;  %s2525_s23 = sshll.u32 %s2752_s12, 5 }
  0x12   : > { %p187_p6 = scmp.lt.s32.totalorder %s2525_s23, 127  ;;  %s2526_s24 = sshll.u32 %s3730_s13, 7 }
  0x13   : > { %s183_s6 = scalar_lea.vmem %s3695_s0, %s2687_s30 }
  0x14   : > { %598 = vmatpush.bf16.msrb.mxu1 %v589_v4  ;;  %788 = vmatpush.bf16.msrb.mxu2 %v779_v5  ;;  %s2849_s7 = scalar_lea.vmem %s183_s6, %s2529_s27  ;;  %s3732_s23 = smov (!%p187_p6, %s2525_s23), 127 }
  0x15   : > { %1094 = vmatpush.bf16.msrb.mxu3 %v1085_v7  ;;  %1234 = vmatpush.bf16.msrb.mxu0 %v1225_v9  ;;  %v208_v10 = vld [vmem:[%s2849_s7 + $0x50] sm:$0xff]  ;;  %v209_v11 = vld [vmem:[%s2849_s7 + $0x58] sm:$0xff]  ;;  %v210_v12 = vld [vmem:[%s2849_s7 + $0x60] sm:$0xff]  ;;  %s190_s12 = sadd.s32 %s2526_s24, %s3732_s23 }
  0x16   : > { %260 = vst.msk [vmem:[#allocation2 + $0x50] sm:$0xff] %vm248_vm1, %v208_v10  ;;  %v218_v13 = vld [vmem:[%s2849_s7 + $0xa0] sm:$0xff]  ;;  %v219_v14 = vld [vmem:[%s2849_s7 + $0xa8] sm:$0xff]  ;;  %v220_v15 = vld [vmem:[%s2849_s7 + $0xb0] sm:$0xff]  ;;  %s2527_s13 = sshll.u32 %s190_s12, 3 }
  0x17   : > { %261 = vst.msk [vmem:[#allocation2 + $0x58] sm:$0xff] %vm248_vm1, %v209_v11  ;;  %v228_v16 = vld [vmem:[%s2849_s7 + $0xf0] sm:$0xff]  ;;  %v229_v17 = vld [vmem:[%s2849_s7 + $0xf8] sm:$0xff]  ;;  %v230_v18 = vld [vmem:[%s2849_s7 + $0x100] sm:$0xff]  ;;  %s3449_s29 = scalar_lea.vmem %s3698_s3, %s2527_s13 }
  0x18   : > { %262 = vst.msk [vmem:[#allocation2 + $0x60] sm:$0xff] %vm248_vm1, %v210_v12  ;;  %v198_v19 = vld [vmem:[%s2849_s7] sm:$0xff]  ;;  %v199_v20 = vld [vmem:[%s2849_s7 + $0x8] sm:$0xff]  ;;  %v200_v22 = vld [vmem:[%s2849_s7 + $0x10] sm:$0xff] }
  0x19   : > { %270 = vst.msk [vmem:[#allocation2 + $0xa0] sm:$0xff] %vm248_vm1, %v218_v13  ;;  %v211_v24 = vld [vmem:[%s2849_s7 + $0x68] sm:$0xff]  ;;  %v212_v26 = vld [vmem:[%s2849_s7 + $0x70] sm:$0x3]  ;;  %v221_v28 = vld [vmem:[%s2849_s7 + $0xb8] sm:$0xff] }
  0x1a   : > { %271 = vst.msk [vmem:[#allocation2 + $0xa8] sm:$0xff] %vm248_vm1, %v219_v14  ;;  %v222_v30 = vld [vmem:[%s2849_s7 + $0xc0] sm:$0x3]  ;;  %v231_v32 = vld [vmem:[%s2849_s7 + $0x108] sm:$0xff]  ;;  %v232_v34 = vld [vmem:[%s2849_s7 + $0x110] sm:$0x3] }
  0x1b   : > { %272 = vst.msk [vmem:[#allocation2 + $0xb0] sm:$0xff] %vm248_vm1, %v220_v15  ;;  %v201_v36 = vld [vmem:[%s2849_s7 + $0x18] sm:$0xff]  ;;  %v202_v38 = vld [vmem:[%s2849_s7 + $0x20] sm:$0x3]  ;;  %v215_v44 = vld [vmem:[%s2849_s7 + $0x88] sm:$0xff] }
  0x1c   : > { %280 = vst.msk [vmem:[#allocation2 + $0xf0] sm:$0xff] %vm248_vm1, %v228_v16  ;;  %v213_v40 = vld [vmem:[%s2849_s7 + $0x78] sm:$0xff]  ;;  %v214_v42 = vld [vmem:[%s2849_s7 + $0x80] sm:$0xff]  ;;  %v223_v45 = vld [vmem:[%s2849_s7 + $0xc8] sm:$0xff] }
  0x1d   : > { %281 = vst.msk [vmem:[#allocation2 + $0xf8] sm:$0xff] %vm248_vm1, %v229_v17  ;;  %v224_v48 = vld [vmem:[%s2849_s7 + $0xd0] sm:$0xff]  ;;  %v225_v49 = vld [vmem:[%s2849_s7 + $0xd8] sm:$0xff]  ;;  %v234_v54 = vld [vmem:[%s2849_s7 + $0x120] sm:$0xff] }
  0x1e   : > { %v357_v21 = vld [vmem:[#allocation2 + $0x51] sm:$0xff]  ;;  %282 = vst.msk [vmem:[#allocation2 + $0x100] sm:$0xff] %vm248_vm1, %v230_v18  ;;  %v235_v55 = vld [vmem:[%s2849_s7 + $0x128] sm:$0xff]  ;;  %v226_v3 = vld [vmem:[%s2849_s7 + $0xe0] sm:$0xff] }
  0x1f   : > { %v358_v23 = vld [vmem:[#allocation2 + $0x59] sm:$0xff]  ;;  %249 = vst.msk [vmem:[#allocation2] sm:$0xff] %vm248_vm1, %v198_v19  ;;  %v203_v56 = vld [vmem:[%s2849_s7 + $0x28] sm:$0xff]  ;;  %v204_v60 = vld [vmem:[%s2849_s7 + $0x30] sm:$0xff] }
  0x20   : > { %v2874_v25 = vpack.c.bf16 %v358_v23, %v357_v21  ;;  %250 = vst.msk [vmem:[#allocation2 + $0x8] sm:$0xff] %vm248_vm1, %v199_v20  ;;  %v233_v50 = vld [vmem:[%s2849_s7 + $0x118] sm:$0xff]  ;;  %v216_v62 = vld [vmem:[%s2849_s7 + $0x90] sm:$0xff]  ;;  %v227_v4 = vld [vmem:[%s2849_s7 + $0xe8] sm:$0x3] }
  0x21   : > { %v365_v27 = vld [vmem:[#allocation2 + $0xa1] sm:$0xff]  ;;  %251 = vst.msk [vmem:[#allocation2 + $0x10] sm:$0xff] %vm248_vm1, %v200_v22  ;;  %v205_v61 = vld [vmem:[%s2849_s7 + $0x38] sm:$0xff]  ;;  %v236_v6 = vld [vmem:[%s2849_s7 + $0x130] sm:$0xff] }
  0x22   : > { %2535 = vmatmul.msk.bf16.vlgmr.msra.gmra.mxu1 %vm248_vm1, %v2874_v25  ;;  %v366_v29 = vld [vmem:[#allocation2 + $0xa9] sm:$0xff]  ;;  %263 = vst.msk [vmem:[#allocation2 + $0x68] sm:$0xff] %vm248_vm1, %v211_v24  ;;  %v217_v2 = vld [vmem:[%s2849_s7 + $0x98] sm:$0x3]  ;;  %v206_v8 = vld [vmem:[%s2849_s7 + $0x40] sm:$0xff] }
  0x23   : > { %v2884_v31 = vpack.c.bf16 %v366_v29, %v365_v27  ;;  %264 = vst.msk [vmem:[#allocation2 + $0x70] sm:$0x3] %vm253_vm2, %v212_v26  ;;  %v237_v7 = vld [vmem:[%s2849_s7 + $0x138] sm:$0x3]  ;;  %v207_v9 = vld [vmem:[%s2849_s7 + $0x48] sm:$0x3] }
  0x24   : > { %v373_v33 = vld [vmem:[#allocation2 + $0xf1] sm:$0xff]  ;;  %273 = vst.msk [vmem:[#allocation2 + $0xb8] sm:$0xff] %vm248_vm1, %v221_v28  ;;  %v2614_v22 = vld [vmem:[%s3696_s1 + $0xa] sm:$0x3]  ;;  %v2632_v27 = vld [vmem:[%s3696_s1 + $0xe] sm:$0x3] }
  0x25   : > { %2539 = vmatmul.msk.bf16.vlgmr.msra.gmra.mxu2 %vm248_vm1, %v2884_v31  ;;  %v374_v35 = vld [vmem:[#allocation2 + $0xf9] sm:$0xff]  ;;  %274 = vst.msk [vmem:[#allocation2 + $0xc0] sm:$0x3] %vm253_vm2, %v222_v30  ;;  %v1415_v23 = vsel %vm447_vm0, %v2614_v22, 0  ;;  %v2631_v28 = vld [vmem:[%s3696_s1 + $0xc] sm:$0x3] }
  0x26   : > { %v2894_v37 = vpack.c.bf16 %v374_v35, %v373_v33  ;;  %283 = vst.msk [vmem:[#allocation2 + $0x108] sm:$0xff] %vm248_vm1, %v231_v32  ;;  %1424 = vmatpush.bf16.msra.mxu1 %v1415_v23  ;;  %v2665_v29 = vld [vmem:[%s3696_s1 + $0x10] sm:$0x3]  ;;  %v1784_v30 = vsel %vm447_vm0, %v2632_v27, 0  ;;  %v1924_v32 = vsel %vm447_vm0, %v2631_v28, 0 }
  0x27   : > { %v349_v39 = vld [vmem:[#allocation2 + $0x1] sm:$0xff]  ;;  %284 = vst.msk [vmem:[#allocation2 + $0x110] sm:$0x3] %vm253_vm2, %v232_v34  ;;  %v2114_v33 = vsel %vm447_vm0, %v2665_v29, 0  ;;  %1793 = vmatpush.bf16.msra.mxu2 %v1784_v30 }
  0x28   : > { %2543 = vmatmul.msk.bf16.vlgmr.msra.gmra.mxu3 %vm248_vm1, %v2894_v37  ;;  %v350_v41 = vld [vmem:[#allocation2 + $0x9] sm:$0xff]  ;;  %252 = vst.msk [vmem:[#allocation2 + $0x18] sm:$0xff] %vm248_vm1, %v201_v36 }
  0x29   : > { %v381_v43 = vpack.c.bf16 %v350_v41, %v349_v39  ;;  %254 = vst.msk [vmem:[#allocation2 + $0x20] sm:$0x3] %vm253_vm2, %v202_v38  ;;  %v359_v46 = vld [vmem:[#allocation2 + $0x61] sm:$0xff]  ;;  %1933 = vmatpush.bf16.msra.mxu3 %v1924_v32 }
  0x2a   : > { %265 = vst.msk [vmem:[#allocation2 + $0x78] sm:$0xff] %vm248_vm1, %v213_v40  ;;  %v360_v47 = vld [vmem:[#allocation2 + $0x69] sm:$0xff] }
  0x2b   : > { %2531 = vmatmul.msk.bf16.vlgmr.msra.gmra.mxu0 %vm248_vm1, %v381_v43  ;;  %266 = vst.msk [vmem:[#allocation2 + $0x80] sm:$0xff] %vm248_vm1, %v214_v42  ;;  %v2915_v51 = vpack.c.bf16 %v360_v47, %v359_v46  ;;  %v367_v52 = vld [vmem:[#allocation2 + $0xb1] sm:$0xff]  ;;  %v301_v46 = vld [vmem:[#allocation2 + $0x8] sm:$0xff] }
  0x2c   : > { %267 = vst.msk [vmem:[#allocation2 + $0x88] sm:$0xff] %vm248_vm1, %v215_v44  ;;  %v368_v53 = vld [vmem:[#allocation2 + $0xb9] sm:$0xff]  ;;  %2123 = vmatpush.bf16.msra.mxu0 %v2114_v33  ;;  %v690_v27 = vld [vmem:[#allocation2 + $0x62] sm:$0xff]  ;;  %v691_v28 = vld [vmem:[#allocation2 + $0x6a] sm:$0xff] }
  0x2d   : > { %275 = vst.msk [vmem:[#allocation2 + $0xc8] sm:$0xff] %vm248_vm1, %v223_v45  ;;  %v2923_v57 = vpack.c.bf16 %v368_v53, %v367_v52  ;;  %v375_v58 = vld [vmem:[#allocation2 + $0x101] sm:$0xff]  ;;  %v3057_v33 = vpack.c.bf16 %v691_v28, %v690_v27 }
  0x2e   : > { %276 = vst.msk [vmem:[#allocation2 + $0xd0] sm:$0xff] %vm248_vm1, %v224_v48  ;;  %v376_v59 = vld [vmem:[#allocation2 + $0x109] sm:$0xff]  ;;  %v300_v45 = vld [vmem:[#allocation2] sm:$0xff] }
  0x2f   : > { %277 = vst.msk [vmem:[#allocation2 + $0xd8] sm:$0xff] %vm248_vm1, %v225_v49  ;;  %v2933_v63 = vpack.c.bf16 %v376_v59, %v375_v58  ;;  %v351_v0 = vld [vmem:[#allocation2 + $0x11] sm:$0xff]  ;;  %v332_v47 = vpack.c.bf16 %v301_v46, %v300_v45  ;;  %v680_v48 = vld [vmem:[#allocation2 + $0x2] sm:$0xff] }
  0x30   : > { %285 = vst.msk [vmem:[#allocation2 + $0x118] sm:$0xff] %vm248_vm1, %v233_v50  ;;  %v352_v1 = vld [vmem:[#allocation2 + $0x19] sm:$0xff]  ;;  %v681_v49 = vld [vmem:[#allocation2 + $0xa] sm:$0xff] }
  0x31   : > { %286 = vst.msk [vmem:[#allocation2 + $0x120] sm:$0xff] %vm248_vm1, %v234_v54  ;;  %v382_v5 = vpack.c.bf16 %v352_v1, %v351_v0  ;;  %v712_v50 = vpack.c.bf16 %v681_v49, %v680_v48  ;;  %v682_v59 = vld [vmem:[#allocation2 + $0x12] sm:$0xff] }
  0x32   : > { %2536 = vmatmul.msk.bf16.gmra.mxu1 %vm248_vm1, %v2915_v51  ;;  %287 = vst.msk [vmem:[#allocation2 + $0x128] sm:$0xff] %vm248_vm1, %v235_v55  ;;  %v361_v10 = vld [vmem:[#allocation2 + $0x79] sm:$0xff]  ;;  %v302_v55 = vld [vmem:[#allocation2 + $0x10] sm:$0xff] }
  0x33   : > { %255 = vst.msk [vmem:[#allocation2 + $0x28] sm:$0xff] %vm248_vm1, %v203_v56  ;;  %v362_v11 = vld [vmem:[#allocation2 + $0x81] sm:$0xff]  ;;  %v303_v56 = vld [vmem:[#allocation2 + $0x18] sm:$0xff] }
  0x34   : > { %256 = vst.msk [vmem:[#allocation2 + $0x30] sm:$0xff] %vm248_vm1, %v204_v60  ;;  %v2957_v12 = vpack.c.bf16 %v362_v11, %v361_v10  ;;  %v333_v58 = vpack.c.bf16 %v303_v56, %v302_v55  ;;  %v683_v60 = vld [vmem:[#allocation2 + $0x1a] sm:$0xff]  ;;  %v693_v46 = vld [vmem:[#allocation2 + $0x82] sm:$0xff] }
  0x35   : > { %2540 = vmatmul.msk.bf16.gmra.mxu2 %vm248_vm1, %v2923_v57  ;;  %257 = vst.msk [vmem:[#allocation2 + $0x38] sm:$0xff] %vm248_vm1, %v205_v61  ;;  %v369_v13 = vld [vmem:[#allocation2 + $0xc9] sm:$0xff]  ;;  %v713_v61 = vpack.c.bf16 %v683_v60, %v682_v59  ;;  %v942_v11 = vld [vmem:[#allocation2 + $0x60] sm:$0xff] }
  0x36   : > { %268 = vst.msk [vmem:[#allocation2 + $0x90] sm:$0xff] %vm248_vm1, %v216_v62  ;;  %v370_v14 = vld [vmem:[#allocation2 + $0xd1] sm:$0xff]  ;;  %v692_v45 = vld [vmem:[#allocation2 + $0x7a] sm:$0xff] }
  0x37   : > { %269 = vst.msk [vmem:[#allocation2 + $0x98] sm:$0x3] %vm253_vm2, %v217_v2  ;;  %v2959_v15 = vpack.c.bf16 %v370_v14, %v369_v13  ;;  %v943_v13 = vld [vmem:[#allocation2 + $0x68] sm:$0xff] }
  0x38   : > { %2544 = vmatmul.msk.bf16.gmra.mxu3 %vm248_vm1, %v2933_v63  ;;  %278 = vst.msk [vmem:[#allocation2 + $0xe0] sm:$0xff] %vm248_vm1, %v226_v3  ;;  %v377_v16 = vld [vmem:[#allocation2 + $0x119] sm:$0xff]  ;;  %v3023_v14 = vpack.c.bf16 %v943_v13, %v942_v11 }
  0x39   : > { %279 = vst.msk [vmem:[#allocation2 + $0xe8] sm:$0x3] %vm253_vm2, %v227_v4  ;;  %v378_v17 = vld [vmem:[#allocation2 + $0x121] sm:$0xff] }
  0x3a   : > { %288 = vst.msk [vmem:[#allocation2 + $0x130] sm:$0xff] %vm248_vm1, %v236_v6  ;;  %v2963_v18 = vpack.c.bf16 %v378_v17, %v377_v16  ;;  %v936_v52 = vld [vmem:[#allocation2 + $0x28] sm:$0xff]  ;;  %v941_v6 = vld [vmem:[#allocation2 + $0x58] sm:$0xff] }
  0x3b   : > { %2532 = vmatmul.msk.bf16.gmra.mxu0 %vm248_vm1, %v382_v5  ;;  %289 = vst.msk [vmem:[#allocation2 + $0x138] sm:$0x3] %vm253_vm2, %v237_v7  ;;  %v353_v19 = vld [vmem:[#allocation2 + $0x29] sm:$0xff]  ;;  %v689_v16 = vld [vmem:[#allocation2 + $0x5a] sm:$0xff] }
  0x3c   : > { %258 = vst.msk [vmem:[#allocation2 + $0x40] sm:$0xff] %vm248_vm1, %v206_v8  ;;  %v354_v20 = vld [vmem:[#allocation2 + $0x31] sm:$0xff] }
  0x3d   : > { %259 = vst.msk [vmem:[#allocation2 + $0x48] sm:$0x3] %vm253_vm2, %v207_v9  ;;  %v383_v21 = vpack.c.bf16 %v354_v20, %v353_v19  ;;  %v363_v24 = vld [vmem:[#allocation2 + $0x89] sm:$0xff]  ;;  %v938_v62 = vld [vmem:[#allocation2 + $0x38] sm:$0xff] }
  0x3e   : > { %v364_v26 = vld [vmem:[#allocation2 + $0x91] sm:$0xff] }
  0x3f   : > { %v2986_v34 = vpack.c.bf16 %v364_v26, %v363_v24  ;;  %v371_v35 = vld [vmem:[#allocation2 + $0xd9] sm:$0xff]  ;;  %v937_v53 = vld [vmem:[#allocation2 + $0x30] sm:$0xff] }
  0x40   : > { %v372_v36 = vld [vmem:[#allocation2 + $0xe1] sm:$0xff]  ;;  %v968_v54 = vpack.c.bf16 %v937_v53, %v936_v52  ;;  %v684_v2 = vld [vmem:[#allocation2 + $0x2a] sm:$0xff]  ;;  %v685_v3 = vld [vmem:[#allocation2 + $0x32] sm:$0xff] }
  0x41   : > { %v2988_v38 = vpack.c.bf16 %v372_v36, %v371_v35  ;;  %v379_v39 = vld [vmem:[#allocation2 + $0x129] sm:$0xff]  ;;  %v3007_v4 = vpack.c.bf16 %v685_v3, %v684_v2  ;;  %v944_v20 = vld [vmem:[#allocation2 + $0x78] sm:$0xff]  ;;  %v948_v52 = vld [vmem:[#allocation2 + $0xa0] sm:$0xff] }
  0x42   : > { %2537 = vmatmul.msk.bf16.gmra.mxu1 %vm248_vm1, %v2957_v12  ;;  %v380_v40 = vld [vmem:[#allocation2 + $0x131] sm:$0xff]  ;;  %v946_v35 = vld [vmem:[#allocation2 + $0x88] sm:$0xff] }
  0x43   : > { %v2992_v41 = vpack.c.bf16 %v380_v40, %v379_v39  ;;  %v355_v42 = vld [vmem:[#allocation2 + $0x39] sm:$0xff]  ;;  %v940_v5 = vld [vmem:[#allocation2 + $0x50] sm:$0xff]  ;;  %v949_v53 = vld [vmem:[#allocation2 + $0xa8] sm:$0xff] }
  0x44   : > { %v356_v43 = vld [vmem:[#allocation2 + $0x41] sm:$0xff]  ;;  %v3012_v7 = vpack.c.bf16 %v941_v6, %v940_v5  ;;  %v947_v36 = vld [vmem:[#allocation2 + $0x90] sm:$0xff]  ;;  %v951_v5 = vld [vmem:[#allocation2 + $0xb8] sm:$0xff] }
  0x45   : > { %2541 = vmatmul.msk.bf16.gmra.mxu2 %vm248_vm1, %v2959_v15  ;;  %v384_v44 = vpack.c.bf16 %v356_v43, %v355_v42  ;;  %v939_v0 = vld [vmem:[#allocation2 + $0x40] sm:$0xff]  ;;  %v3065_v39 = vpack.c.bf16 %v947_v36, %v946_v35  ;;  %v694_v60 = vld [vmem:[#allocation2 + $0x8a] sm:$0xff] }
  0x46   : > { %v969_v1 = vpack.c.bf16 %v939_v0, %v938_v62  ;;  %v686_v8 = vld [vmem:[#allocation2 + $0x3a] sm:$0xff]  ;;  %v687_v9 = vld [vmem:[#allocation2 + $0x42] sm:$0xff]  ;;  %v950_v3 = vld [vmem:[#allocation2 + $0xb0] sm:$0xff] }
  0x47   : > { %v3018_v10 = vpack.c.bf16 %v687_v9, %v686_v8  ;;  %v3121_v6 = vpack.c.bf16 %v951_v5, %v950_v3  ;;  %v952_v35 = vld [vmem:[#allocation2 + $0xc8] sm:$0xff]  ;;  %v953_v36 = vld [vmem:[#allocation2 + $0xd0] sm:$0xff] }
  0x48   : > { %2545 = vmatmul.msk.bf16.gmra.mxu3 %vm248_vm1, %v2963_v18 }
  0x4b   : > { %2533 = vmatmul.msk.bf16.gmra.mxu0 %vm248_vm1, %v383_v21 }
  0x52   : > { %2538 = vmatmul.msk.bf16.gmra.mxu1 %vm248_vm1, %v2986_v34 }
  0x55   : > { %2542 = vmatmul.msk.bf16.gmra.mxu2 %vm248_vm1, %v2988_v38 }
  0x58   : > { %2546 = vmatmul.msk.bf16.gmra.mxu3 %vm248_vm1, %v2992_v41 }
  0x5b   : > { %2534 = vmatmul.msk.bf16.gmra.mxu0 %vm248_vm1, %v384_v44 }
  0x62   : > { %2547 = vmatmul.msk.bf16.vlgmr.msrb.gmra.mxu1 %vm248_vm1, %v332_v47 }
  0x65   : > { %2564 = vmatmul.msk.bf16.vlgmr.msrb.gmra.mxu2 %vm248_vm1, %v712_v50  ;;  %v3085_v50 = vpack.c.bf16 %v693_v46, %v692_v45  ;;  %v3148_v46 = vpack.c.bf16 %v953_v36, %v952_v35 }
  0x68   : > { %2582 = vmatmul.msk.bf16.vlgmr.msrb.gmra.mxu3 %vm248_vm1, %v383_v21  ;;  %v945_v21 = vld [vmem:[#allocation2 + $0x80] sm:$0xff] }
  0x69   : > { %v3037_v22 = vpack.c.bf16 %v945_v21, %v944_v20 }
  0x6b   : > { %2598 = vmatmul.msk.bf16.vlgmr.msrb.gmra.mxu0 %vm248_vm1, %v968_v54 }
  0x72   : > { %2548 = vmatmul.msk.bf16.gmra.mxu1 %vm248_vm1, %v333_v58 }
  0x75   : > { %2565 = vmatmul.msk.bf16.gmra.mxu2 %vm248_vm1, %v713_v61  ;;  %v695_v61 = vld [vmem:[#allocation2 + $0x92] sm:$0xff] }
  0x76   : > { %v3113_v2 = vpack.c.bf16 %v695_v61, %v694_v60 }
  0x78   : > { %2583 = vmatmul.msk.bf16.gmra.mxu3 %vm248_vm1, %v384_v44 }
  0x7b   : > { %2599 = vmatmul.msk.bf16.gmra.mxu0 %vm248_vm1, %v969_v1 }
  0x82   : > { %2549 = vmatmul.msk.bf16.gmra.mxu1 %vm248_vm1, %v968_v54  ;;  %v3093_v54 = vpack.c.bf16 %v949_v53, %v948_v52 }
  0x85   : > { %2566 = vmatmul.msk.bf16.gmra.mxu2 %vm248_vm1, %v3007_v4 }
  0x88   : > { %2584 = vmatmul.msk.bf16.gmra.mxu3 %vm248_vm1, %v2874_v25  ;;  %v688_v25 = vld [vmem:[#allocation2 + $0x52] sm:$0xff] }
  0x89   : > { %v3031_v19 = vpack.c.bf16 %v689_v16, %v688_v25  ;;  %v696_v25 = vld [vmem:[#allocation2 + $0xa2] sm:$0xff]  ;;  %v697_v16 = vld [vmem:[#allocation2 + $0xaa] sm:$0xff] }
  0x8a   : > { %v3139_v28 = vpack.c.bf16 %v697_v16, %v696_v25  ;;  %v698_v25 = vld [vmem:[#allocation2 + $0xb2] sm:$0xff] }
  0x8b   : > { %2600 = vmatmul.msk.bf16.gmra.mxu0 %vm248_vm1, %v3012_v7 }
  0x92   : > { %2550 = vmatmul.msk.bf16.gmra.mxu1 %vm248_vm1, %v969_v1 }
  0x95   : > { %2567 = vmatmul.msk.bf16.gmra.mxu2 %vm248_vm1, %v3018_v10 }
  0x98   : > { %2585 = vmatmul.msk.bf16.gmra.mxu3 %vm248_vm1, %v2915_v51 }
  0x9b   : > { %2601 = vmatmul.msk.bf16.gmra.mxu0 %vm248_vm1, %v3023_v14 }
  0x9f   : > { %v3029_v17 = vpop.f32.mrf.mxu1 }
  0xa2   : > { %2551 = vmatmul.msk.bf16.gmra.mxu1 %vm248_vm1, %v3012_v7 }
  0xa5   : > { %2568 = vmatmul.msk.bf16.gmra.mxu2 %vm248_vm1, %v3031_v19 }
  0xa7   : > { %v3039_v51 = vpop.f32.mrf.mxu1 }
  0xa8   : > { %v3041_v23 = vpop.f32.mrf.mxu0  ;;  %2586 = vmatmul.msk.bf16.gmra.mxu3 %vm248_vm1, %v2957_v12  ;;  %v3045_v24 = vpop.f32.mrf.mxu2 }
  0xab   : > { %2602 = vmatmul.msk.bf16.gmra.mxu0 %vm248_vm1, %v3037_v22  ;;  %v3049_v26 = vpop.f32.mrf.mxu3 }
  0xaf   : > { %v3051_v29 = vpop.f32.mrf.mxu1 }
  0xb0   : > { %v3053_v30 = vpop.f32.mrf.mxu0  ;;  %v3055_v32 = vpop.f32.mrf.mxu2 }
  0xb2   : > { %2552 = vmatmul.msk.bf16.gmra.mxu1 %vm248_vm1, %v3023_v14 }
  0xb3   : > { %v3061_v12 = vpop.f32.mrf.mxu3 }
  0xb5   : > { %2569 = vmatmul.msk.bf16.gmra.mxu2 %vm248_vm1, %v3057_v33 }
  0xb7   : > { %v3067_v40 = vpop.f32.mrf.mxu1 }
  0xb8   : > { %v3069_v42 = vpop.f32.mrf.mxu0  ;;  %2587 = vmatmul.msk.bf16.gmra.mxu3 %vm248_vm1, %v2986_v34  ;;  %v3073_v43 = vpop.f32.mrf.mxu2 }
  0xbb   : > { %2603 = vmatmul.msk.bf16.gmra.mxu0 %vm248_vm1, %v3065_v39  ;;  %v3077_v44 = vpop.f32.mrf.mxu3 }
  0xbf   : > { %v3079_v47 = vpop.f32.mrf.mxu1 }
  0xc0   : > { %v3081_v48 = vpop.f32.mrf.mxu0  ;;  %v3083_v49 = vpop.f32.mrf.mxu2 }
  0xc2   : > { %2553 = vmatmul.msk.bf16.gmra.mxu1 %vm248_vm1, %v3037_v22 }
  0xc3   : > { %v3089_v34 = vpop.f32.mrf.mxu3 }
  0xc5   : > { %2570 = vmatmul.msk.bf16.gmra.mxu2 %vm248_vm1, %v3085_v50 }
  0xc7   : > { %v3095_v55 = vpop.f32.mrf.mxu1 }
  0xc8   : > { %v3097_v56 = vpop.f32.mrf.mxu0  ;;  %2588 = vmatmul.msk.bf16.gmra.mxu3 %vm248_vm1, %v2884_v31  ;;  %v3101_v58 = vpop.f32.mrf.mxu2 }
  0xcb   : > { %2604 = vmatmul.msk.bf16.gmra.mxu0 %vm248_vm1, %v3093_v54  ;;  %v3105_v59 = vpop.f32.mrf.mxu3 }
  0xcf   : > { %v3107_v62 = vpop.f32.mrf.mxu1 }
  0xd0   : > { %v3109_v0 = vpop.f32.mrf.mxu0  ;;  %v3111_v1 = vpop.f32.mrf.mxu2 }
  0xd2   : > { %2554 = vmatmul.msk.bf16.gmra.mxu1 %vm248_vm1, %v3065_v39 }
  0xd3   : > { %v3117_v31 = vpop.f32.mrf.mxu3 }
  0xd5   : > { %2571 = vmatmul.msk.bf16.gmra.mxu2 %vm248_vm1, %v3113_v2 }
  0xd7   : > { %v3123_v8 = vpop.f32.mrf.mxu1 }
  0xd8   : > { %v3125_v9 = vpop.f32.mrf.mxu0  ;;  %2589 = vmatmul.msk.bf16.gmra.mxu3 %vm248_vm1, %v2923_v57  ;;  %v3129_v11 = vpop.f32.mrf.mxu2 }
  0xdb   : > { %2605 = vmatmul.msk.bf16.gmra.mxu0 %vm248_vm1, %v3121_v6  ;;  %v3133_v13 = vpop.f32.mrf.mxu3 }
  0xdf   : > { %v600_v20 = vpop.f32.mrf.mxu1 }
  0xe0   : > { %v3135_v21 = vpop.f32.mrf.mxu0  ;;  %v3137_v27 = vpop.f32.mrf.mxu2  ;;  %v601_v45 = vadd.f32 %v600_v20, %v3041_v23  ;;  %v699_v23 = vld [vmem:[#allocation2 + $0xba] sm:$0xff] }
  0xe2   : > { %2555 = vmatmul.msk.bf16.gmra.mxu1 %vm248_vm1, %v3093_v54 }
  0xe3   : > { %v3143_v57 = vpop.f32.mrf.mxu3 }
  0xe4   : > { %3699 = vst [vmem:[#allocation4_spill] sm:$0xff] %v3143_v57 }
  0xe5   : > { %2572 = vmatmul.msk.bf16.gmra.mxu2 %vm248_vm1, %v3139_v28 }
  0xe7   : > { %v602_v52 = vpop.f32.mrf.mxu1 }
  0xe8   : > { %v1236_v53 = vpop.f32.mrf.mxu0  ;;  %2590 = vmatmul.msk.bf16.gmra.mxu3 %vm248_vm1, %v2959_v15  ;;  %v790_v60 = vpop.f32.mrf.mxu2  ;;  %v603_v16 = vadd.f32 %v602_v52, %v3053_v30  ;;  %v3158_v15 = vpack.c.bf16 %v699_v23, %v698_v25 }
  0xe9   : > { %v870_v61 = vadd.f32 %v790_v60, %v601_v45 }
  0xeb   : > { %2606 = vmatmul.msk.bf16.gmra.mxu0 %vm248_vm1, %v3148_v46  ;;  %903 = vst.msk [vmem:[#allocation3] sm:$0xff] %vm902_vm3, %v870_v61  ;;  %v1096_v3 = vpop.f32.mrf.mxu3  ;;  %v955_v61 = vld [vmem:[#allocation2 + $0xe0] sm:$0xff] }
  0xec   : > { %v3155_v5 = vadd.f32 %v1236_v53, %v1096_v3  ;;  %v954_v53 = vld [vmem:[#allocation2 + $0xd8] sm:$0xff] }
  0xed   : > { %v3168_v52 = vpack.c.bf16 %v955_v61, %v954_v53 }
  0xee   : > { %3700 = vst [vmem:[#allocation5_spill] sm:$0xff] %v3155_v5 }
  0xef   : > { %v605_v20 = vpop.f32.mrf.mxu1 }
  0xf0   : > { %v1238_v35 = vpop.f32.mrf.mxu0  ;;  %v792_v36 = vpop.f32.mrf.mxu2  ;;  %v606_v30 = vadd.f32 %v605_v20, %v3069_v42 }
  0xf1   : > { %v871_v57 = vadd.f32 %v792_v36, %v603_v16  ;;  %v700_v36 = vld [vmem:[#allocation2 + $0xca] sm:$0xff] }
  0xf2   : > { %2556 = vmatmul.msk.bf16.gmra.mxu1 %vm248_vm1, %v3121_v6 }
  0xf3   : > { %904 = vst.msk [vmem:[#allocation3 + $0x8] sm:$0xff] %vm902_vm3, %v871_v57  ;;  %v1098_v45 = vpop.f32.mrf.mxu3 }
  0xf4   : > { %v3163_v60 = vadd.f32 %v1238_v35, %v1098_v45  ;;  %v701_v45 = vld [vmem:[#allocation2 + $0xd2] sm:$0xff] }
  0xf5   : > { %2573 = vmatmul.msk.bf16.gmra.mxu2 %vm248_vm1, %v3158_v15  ;;  %v3178_v5 = vpack.c.bf16 %v701_v45, %v700_v36 }
  0xf6   : > { %3701 = vst [vmem:[#allocation6_spill] sm:$0xff] %v3163_v60 }
  0xf7   : > { %v607_v3 = vpop.f32.mrf.mxu1 }
  0xf8   : > { %v1241_v25 = vpop.f32.mrf.mxu0  ;;  %2591 = vmatmul.msk.bf16.gmra.mxu3 %vm248_vm1, %v2988_v38  ;;  %v795_v23 = vpop.f32.mrf.mxu2  ;;  %v608_v42 = vadd.f32 %v607_v3, %v3081_v48 }
  0xf9   : > { %v872_v16 = vadd.f32 %v795_v23, %v606_v30  ;;  %v957_v23 = vld [vmem:[#allocation2 + $0xf8] sm:$0xff] }
  0xfb   : > { %2607 = vmatmul.msk.bf16.gmra.mxu0 %vm248_vm1, %v3168_v52  ;;  %905 = vst.msk [vmem:[#allocation3 + $0x10] sm:$0xff] %vm902_vm3, %v872_v16  ;;  %v1101_v57 = vpop.f32.mrf.mxu3 }
  0xfc   : > { %v3175_v35 = vadd.f32 %v1241_v25, %v1101_v57  ;;  %v956_v25 = vld [vmem:[#allocation2 + $0xf0] sm:$0xff] }
  0xfd   : > { %v3188_v3 = vpack.c.bf16 %v957_v23, %v956_v25 }
  0xff   : > { %v610_v20 = vpop.f32.mrf.mxu1 }
 0x100   : > { %v1243_v53 = vpop.f32.mrf.mxu0  ;;  %v797_v61 = vpop.f32.mrf.mxu2  ;;  %v611_v48 = vadd.f32 %v610_v20, %v3097_v56 }
 0x101   : > { %v873_v60 = vadd.f32 %v797_v61, %v608_v42  ;;  %v703_v61 = vld [vmem:[#allocation2 + $0xe2] sm:$0xff] }
 0x102   : > { %2557 = vmatmul.msk.bf16.gmra.mxu1 %vm248_vm1, %v3148_v46 }
 0x103   : > { %906 = vst.msk [vmem:[#allocation3 + $0x18] sm:$0xff] %vm902_vm3, %v873_v60  ;;  %v1103_v38 = vpop.f32.mrf.mxu3 }
 0x104   : > { %v3183_v30 = vadd.f32 %v1243_v53, %v1103_v38  ;;  %v702_v53 = vld [vmem:[#allocation2 + $0xda] sm:$0xff] }
 0x105   : > { %2574 = vmatmul.msk.bf16.gmra.mxu2 %vm248_vm1, %v3178_v5 }
 0x106   : > { %3702 = vst [vmem:[#allocation7_spill] sm:$0xff] %v3183_v30  ;;  %v3198_v30 = vpack.c.bf16 %v703_v61, %v702_v53 }
 0x107   : > { %v612_v16 = vpop.f32.mrf.mxu1 }
 0x108   : > { %v1246_v57 = vpop.f32.mrf.mxu0  ;;  %2592 = vmatmul.msk.bf16.gmra.mxu3 %vm248_vm1, %v2894_v37  ;;  %v800_v36 = vpop.f32.mrf.mxu2  ;;  %v613_v56 = vadd.f32 %v612_v16, %v3109_v0 }
 0x109   : > { %v874_v45 = vadd.f32 %v800_v36, %v611_v48  ;;  %v959_v36 = vld [vmem:[#allocation2 + $0x108] sm:$0xff] }
 0x10b   : > { %2608 = vmatmul.msk.bf16.gmra.mxu0 %vm248_vm1, %v3188_v3  ;;  %907 = vst.msk [vmem:[#allocation3 + $0x20] sm:$0xff] %vm902_vm3, %v874_v45  ;;  %v1106_v60 = vpop.f32.mrf.mxu3 }
 0x10c   : > { %v3195_v42 = vadd.f32 %v1246_v57, %v1106_v60  ;;  %v958_v57 = vld [vmem:[#allocation2 + $0x100] sm:$0xff] }
 0x10d   : > { %v3208_v16 = vpack.c.bf16 %v959_v36, %v958_v57 }
 0x10f   : > { %v615_v20 = vpop.f32.mrf.mxu1 }
 0x110   : > { %v1248_v38 = vpop.f32.mrf.mxu0  ;;  %v802_v25 = vpop.f32.mrf.mxu2  ;;  %v616_v0 = vadd.f32 %v615_v20, %v3125_v9  ;;  %v238_v9 = vld [vmem:[%s2849_s7 + $0x140] sm:$0xff]  ;;  %v239_v20 = vld [vmem:[%s2849_s7 + $0x148] sm:$0xff] }
 0x111   : > { %v875_v23 = vadd.f32 %v802_v25, %v613_v56  ;;  %v704_v25 = vld [vmem:[#allocation2 + $0xf2] sm:$0xff]  ;;  %290 = vst.msk [vmem:[#allocation2 + $0x140] sm:$0xff] %vm248_vm1, %v238_v9 }
 0x112   : > { %2558 = vmatmul.msk.bf16.gmra.mxu1 %vm248_vm1, %v3168_v52  ;;  %291 = vst.msk [vmem:[#allocation2 + $0x148] sm:$0xff] %vm248_vm1, %v239_v20 }
 0x113   : > { %908 = vst.msk [vmem:[#allocation3 + $0x28] sm:$0xff] %vm902_vm3, %v875_v23  ;;  %v1108_v37 = vpop.f32.mrf.mxu3  ;;  %v705_v23 = vld [vmem:[#allocation2 + $0xfa] sm:$0xff] }
 0x114   : > { %v3203_v48 = vadd.f32 %v1248_v38, %v1108_v37  ;;  %v240_v37 = vld [vmem:[%s2849_s7 + $0x150] sm:$0xff] }
 0x115   : > { %2575 = vmatmul.msk.bf16.gmra.mxu2 %vm248_vm1, %v3198_v30  ;;  %292 = vst.msk [vmem:[#allocation2 + $0x150] sm:$0xff] %vm248_vm1, %v240_v37 }
 0x116   : > { %3703 = vst [vmem:[#allocation8_spill] sm:$0xff] %v3203_v48  ;;  %v3223_v48 = vpack.c.bf16 %v705_v23, %v704_v25 }
 0x117   : > { %v617_v45 = vpop.f32.mrf.mxu1 }
 0x118   : > { %v1251_v60 = vpop.f32.mrf.mxu0  ;;  %2593 = vmatmul.msk.bf16.gmra.mxu3 %vm248_vm1, %v2933_v63  ;;  %v805_v53 = vpop.f32.mrf.mxu2  ;;  %v618_v57 = vadd.f32 %v617_v45, %v3135_v21  ;;  %v960_v21 = vld [vmem:[#allocation2 + $0x118] sm:$0xff]  ;;  %v961_v45 = vld [vmem:[#allocation2 + $0x120] sm:$0xff] }
 0x119   : > { %v876_v61 = vadd.f32 %v805_v53, %v616_v0  ;;  %v3234_v25 = vpack.c.bf16 %v961_v45, %v960_v21 }
 0x11b   : > { %2609 = vmatmul.msk.bf16.gmra.mxu0 %vm248_vm1, %v3208_v16  ;;  %909 = vst.msk [vmem:[#allocation3 + $0x30] sm:$0xff] %vm902_vm3, %v876_v61  ;;  %v1111_v56 = vpop.f32.mrf.mxu3 }
 0x11c   : > { %v3215_v38 = vadd.f32 %v1251_v60, %v1111_v56 }
 0x11f   : > { %v620_v36 = vpop.f32.mrf.mxu1 }
 0x120   : > { %v1253_v63 = vpop.f32.mrf.mxu0  ;;  %v807_v0 = vpop.f32.mrf.mxu2  ;;  %v621_v56 = vadd.f32 %v620_v36, %v3029_v17  ;;  %v241_v17 = vld [vmem:[%s2849_s7 + $0x158] sm:$0xff]  ;;  %v242_v36 = vld [vmem:[%s2849_s7 + $0x160] sm:$0x3] }
 0x121   : > { %v877_v53 = vadd.f32 %v807_v0, %v618_v57  ;;  %v706_v0 = vld [vmem:[#allocation2 + $0x102] sm:$0xff]  ;;  %293 = vst.msk [vmem:[#allocation2 + $0x158] sm:$0xff] %vm248_vm1, %v241_v17 }
 0x122   : > { %2559 = vmatmul.msk.bf16.gmra.mxu1 %vm248_vm1, %v3188_v3  ;;  %294 = vst.msk [vmem:[#allocation2 + $0x160] sm:$0x3] %vm253_vm2, %v242_v36 }
 0x123   : > { %910 = vst.msk [vmem:[#allocation3 + $0x38] sm:$0xff] %vm902_vm3, %v877_v53  ;;  %v1113_v60 = vpop.f32.mrf.mxu3  ;;  %v707_v53 = vld [vmem:[#allocation2 + $0x10a] sm:$0xff] }
 0x124   : > { %v3229_v61 = vadd.f32 %v1253_v63, %v1113_v60 }
 0x125   : > { %2576 = vmatmul.msk.bf16.gmra.mxu2 %vm248_vm1, %v3223_v48 }
 0x126   : > { %3704 = vst [vmem:[#allocation9_spill] sm:$0xff] %v3229_v61  ;;  %v1015_v61 = vld [vmem:[#allocation2 + $0x149] sm:$0xff] }
 0x127   : > { %v622_v23 = vpop.f32.mrf.mxu1 }
 0x128   : > { %v1256_v9 = vpop.f32.mrf.mxu0  ;;  %2594 = vmatmul.msk.bf16.gmra.mxu3 %vm248_vm1, %v2963_v18  ;;  %v810_v20 = vpop.f32.mrf.mxu2  ;;  %v623_v60 = vadd.f32 %v622_v23, %v3039_v51  ;;  %v963_v51 = vld [vmem:[#allocation2 + $0x130] sm:$0xff] }
 0x129   : > { %v878_v37 = vadd.f32 %v810_v20, %v621_v56  ;;  %v3248_v20 = vpack.c.bf16 %v707_v53, %v706_v0 }
 0x12b   : > { %2610 = vmatmul.msk.bf16.gmra.mxu0 %vm248_vm1, %v3234_v25  ;;  %911 = vst.msk [vmem:[#allocation3 + $0x40] sm:$0xff] %vm902_vm3, %v878_v37  ;;  %v1116_v57 = vpop.f32.mrf.mxu3 }
 0x12c   : > { %v3241_v63 = vadd.f32 %v1256_v9, %v1116_v57  ;;  %v962_v57 = vld [vmem:[#allocation2 + $0x128] sm:$0xff] }
 0x12d   : > { %v981_v17 = vpack.c.bf16 %v963_v51, %v962_v57 }
 0x12e   : > { %3705 = vst [vmem:[#allocation10_spill] sm:$0xff] %v3241_v63 }
 0x12f   : > { %v625_v21 = vpop.f32.mrf.mxu1 }
 0x130   : > { %v1258_v18 = vpop.f32.mrf.mxu0  ;;  %v812_v45 = vpop.f32.mrf.mxu2  ;;  %v626_v23 = vadd.f32 %v625_v21, %v3051_v29 }
 0x131   : > { %v879_v56 = vadd.f32 %v812_v45, %v623_v60 }
 0x132   : > { %2560 = vmatmul.msk.bf16.gmra.mxu1 %vm248_vm1, %v3208_v16 }
 0x133   : > { %912 = vst.msk [vmem:[#allocation3 + $0x48] sm:$0xff] %vm902_vm3, %v879_v56  ;;  %v1118_v9 = vpop.f32.mrf.mxu3  ;;  %v708_v56 = vld [vmem:[#allocation2 + $0x11a] sm:$0xff] }
 0x134   : > { %v3253_v37 = vadd.f32 %v1258_v18, %v1118_v9  ;;  %v709_v9 = vld [vmem:[#allocation2 + $0x122] sm:$0xff] }
 0x135   : > { %2577 = vmatmul.msk.bf16.gmra.mxu2 %vm248_vm1, %v3248_v20  ;;  %v3265_v63 = vpack.c.bf16 %v709_v9, %v708_v56 }
 0x136   : > { %3706 = vst [vmem:[#allocation11_spill] sm:$0xff] %v3253_v37 }
 0x137   : > { %v627_v36 = vpop.f32.mrf.mxu1 }
 0x138   : > { %v1261_v60 = vpop.f32.mrf.mxu0  ;;  %2595 = vmatmul.msk.bf16.gmra.mxu3 %vm248_vm1, %v2992_v41  ;;  %v815_v0 = vpop.f32.mrf.mxu2  ;;  %v628_v37 = vadd.f32 %v627_v36, %v3067_v40  ;;  %v1014_v41 = vld [vmem:[#allocation2 + $0x141] sm:$0xff] }
 0x139   : > { %v880_v53 = vadd.f32 %v815_v0, %v626_v23  ;;  %v1032_v0 = vpack.c.bf16 %v1015_v61, %v1014_v41  ;;  %v711_v41 = vld [vmem:[#allocation2 + $0x132] sm:$0xff] }
 0x13b   : > { %2611 = vmatmul.msk.bf16.gmra.mxu0 %vm248_vm1, %v981_v17  ;;  %913 = vst.msk [vmem:[#allocation3 + $0x50] sm:$0xff] %vm902_vm3, %v880_v53  ;;  %v1121_v18 = vpop.f32.mrf.mxu3  ;;  %v964_v53 = vld [vmem:[#allocation2 + $0x140] sm:$0xff] }
 0x13c   : > { %v3262_v45 = vadd.f32 %v1261_v60, %v1121_v18  ;;  %v965_v18 = vld [vmem:[#allocation2 + $0x148] sm:$0xff] }
 0x13e   : > { %3707 = vst [vmem:[#allocation12_spill] sm:$0xff] %v3262_v45  ;;  %v1017_v45 = vld [vmem:[#allocation2 + $0x159] sm:$0xff] }
 0x13f   : > { %v630_v29 = vpop.f32.mrf.mxu1 }
 0x140   : > { %v1263_v21 = vpop.f32.mrf.mxu0  ;;  %v817_v57 = vpop.f32.mrf.mxu2  ;;  %v631_v40 = vadd.f32 %v630_v29, %v3079_v47 }
 0x141   : > { %v881_v51 = vadd.f32 %v817_v57, %v628_v37  ;;  %v982_v37 = vpack.c.bf16 %v965_v18, %v964_v53 }
 0x142   : > { %2561 = vmatmul.msk.bf16.gmra.mxu1 %vm248_vm1, %v3234_v25 }
 0x143   : > { %914 = vst.msk [vmem:[#allocation3 + $0x58] sm:$0xff] %vm902_vm3, %v881_v51  ;;  %v1123_v23 = vpop.f32.mrf.mxu3  ;;  %v710_v51 = vld [vmem:[#allocation2 + $0x12a] sm:$0xff] }
 0x144   : > { %v3270_v60 = vadd.f32 %v1263_v21, %v1123_v23  ;;  %v3281_v18 = vpack.c.bf16 %v711_v41, %v710_v51 }
 0x145   : > { %2578 = vmatmul.msk.bf16.gmra.mxu2 %vm248_vm1, %v3265_v63 }
 0x146   : > { %3708 = vst [vmem:[#allocation13_spill] sm:$0xff] %v3270_v60 }
 0x147   : > { %v632_v36 = vpop.f32.mrf.mxu1 }
 0x148   : > { %v1266_v56 = vpop.f32.mrf.mxu0  ;;  %2596 = vmatmul.msk.bf16.gmra.mxu3 %vm248_vm1, %v1032_v0  ;;  %v820_v9 = vpop.f32.mrf.mxu2  ;;  %v633_v23 = vadd.f32 %v632_v36, %v3095_v55  ;;  %v1016_v0 = vld [vmem:[#allocation2 + $0x151] sm:$0xff] }
 0x149   : > { %v882_v57 = vadd.f32 %v820_v9, %v631_v40  ;;  %v966_v9 = vld [vmem:[#allocation2 + $0x150] sm:$0xff] }
 0x14b   : > { %2612 = vmatmul.msk.bf16.gmra.mxu0 %vm248_vm1, %v982_v37  ;;  %915 = vst.msk [vmem:[#allocation3 + $0x60] sm:$0xff] %vm902_vm3, %v882_v57  ;;  %v1126_v21 = vpop.f32.mrf.mxu3  ;;  %v967_v57 = vld [vmem:[#allocation2 + $0x158] sm:$0xff] }
 0x14c   : > { %v3278_v61 = vadd.f32 %v1266_v56, %v1126_v21  ;;  %v1033_v56 = vpack.c.bf16 %v1017_v45, %v1016_v0  ;;  %v983_v36 = vpack.c.bf16 %v967_v57, %v966_v9 }
 0x14f   : > { %v635_v60 = vpop.f32.mrf.mxu1 }
 0x150   : > { %v1268_v47 = vpop.f32.mrf.mxu0  ;;  %v822_v29 = vpop.f32.mrf.mxu2  ;;  %v636_v55 = vadd.f32 %v635_v60, %v3107_v62 }
 0x151   : > { %v883_v53 = vadd.f32 %v822_v29, %v633_v23  ;;  %v1686_v29 = vld [vmem:[#allocation2 + $0x59] sm:$0xff] }
 0x152   : > { %2562 = vmatmul.msk.bf16.gmra.mxu1 %vm248_vm1, %v981_v17 }
 0x153   : > { %916 = vst.msk [vmem:[#allocation3 + $0x68] sm:$0xff] %vm902_vm3, %v883_v53  ;;  %v1128_v40 = vpop.f32.mrf.mxu3 }
 0x154   : > { %v3285_v37 = vadd.f32 %v1268_v47, %v1128_v40  ;;  %v1685_v47 = vld [vmem:[#allocation2 + $0x51] sm:$0xff] }
 0x155   : > { %2579 = vmatmul.msk.bf16.gmra.mxu2 %vm248_vm1, %v3281_v18  ;;  %v1717_v9 = vpack.c.bf16 %v1686_v29, %v1685_v47 }
 0x157   : > { %v637_v21 = vpop.f32.mrf.mxu1 }
 0x158   : > { %v1271_v51 = vpop.f32.mrf.mxu0  ;;  %2597 = vmatmul.msk.bf16.gmra.mxu3 %vm248_vm1, %v1033_v56  ;;  %v825_v41 = vpop.f32.mrf.mxu2  ;;  %v638_v53 = vadd.f32 %v637_v21, %v3123_v8 }
 0x159   : > { %v884_v17 = vadd.f32 %v825_v41, %v636_v55 }
 0x15b   : > { %2613 = vmatmul.msk.bf16.gmra.mxu0 %vm248_vm1, %v983_v36  ;;  %917 = vst.msk [vmem:[#allocation3 + $0x70] sm:$0xff] %vm902_vm3, %v884_v17  ;;  %v1131_v23 = vpop.f32.mrf.mxu3  ;;  %v1687_v17 = vld [vmem:[#allocation2 + $0x61] sm:$0xff] }
 0x15c   : > { %v3293_v45 = vadd.f32 %v1271_v51, %v1131_v23  ;;  %v1688_v23 = vld [vmem:[#allocation2 + $0x69] sm:$0xff] }
 0x15f   : > { %v640_v0 = vpop.f32.mrf.mxu1 }
 0x160   : > { %v1273_v62 = vpop.f32.mrf.mxu0  ;;  %v827_v60 = vpop.f32.mrf.mxu2  ;;  %v641_v55 = vadd.f32 %v640_v0, %v3045_v24 }
 0x161   : > { %v885_v40 = vadd.f32 %v827_v60, %v638_v53 }
 0x162   : > { %2615 = vmatmul.msk.bf16.vlgmr.msra.gmra.mxu1 %vm248_vm1, %v3007_v4 }
 0x163   : > { %918 = vst.msk [vmem:[#allocation3 + $0x78] sm:$0xff] %vm902_vm3, %v885_v40  ;;  %v1133_v56 = vpop.f32.mrf.mxu3 }
 0x164   : > { %v3299_v57 = vadd.f32 %v1273_v62, %v1133_v56  ;;  %v1718_v62 = vpack.c.bf16 %v1688_v23, %v1687_v17 }
 0x165   : > { %2633 = vmatmul.msk.bf16.vlgmr.msra.gmra.mxu2 %vm248_vm1, %v1717_v9 }
 0x167   : > { %v642_v36 = vpop.f32.mrf.mxu1 }
 0x168   : > { %v1276_v51 = vpop.f32.mrf.mxu0  ;;  %2649 = vmatmul.msk.bf16.vlgmr.msra.gmra.mxu3 %vm248_vm1, %v3012_v7  ;;  %v830_v8 = vpop.f32.mrf.mxu2  ;;  %v643_v47 = vadd.f32 %v642_v36, %v3055_v32 }
 0x169   : > { %v886_v21 = vadd.f32 %v830_v8, %v641_v55  ;;  %v1690_v8 = vld [vmem:[#allocation2 + $0x81] sm:$0xff] }
 0x16b   : > { %2666 = vmatmul.msk.bf16.vlgmr.msra.gmra.mxu0 %vm248_vm1, %v3031_v19  ;;  %919 = vst.msk [vmem:[#allocation3 + $0x80] sm:$0xff] %vm902_vm3, %v886_v21  ;;  %v1136_v4 = vpop.f32.mrf.mxu3 }
 0x16c   : > { %v3308_v41 = vadd.f32 %v1276_v51, %v1136_v4  ;;  %v1689_v51 = vld [vmem:[#allocation2 + $0x79] sm:$0xff] }
 0x16f   : > { %v645_v24 = vpop.f32.mrf.mxu1 }
 0x170   : > { %v1278_v29 = vpop.f32.mrf.mxu0  ;;  %v832_v53 = vpop.f32.mrf.mxu2  ;;  %v646_v40 = vadd.f32 %v645_v24, %v3073_v43 }
 0x171   : > { %v887_v0 = vadd.f32 %v832_v53, %v643_v47  ;;  %v1719_v47 = vpack.c.bf16 %v1690_v8, %v1689_v51 }
 0x172   : > { %2616 = vmatmul.msk.bf16.gmra.mxu1 %vm248_vm1, %v3018_v10 }
 0x173   : > { %920 = vst.msk [vmem:[#allocation3 + $0x88] sm:$0xff] %vm902_vm3, %v887_v0  ;;  %v1138_v7 = vpop.f32.mrf.mxu3 }
 0x174   : > { %v3314_v60 = vadd.f32 %v1278_v29, %v1138_v7 }
 0x175   : > { %2634 = vmatmul.msk.bf16.gmra.mxu2 %vm248_vm1, %v1718_v62 }
 0x177   : > { %v647_v9 = vpop.f32.mrf.mxu1 }
 0x178   : > { %v1281_v56 = vpop.f32.mrf.mxu0  ;;  %2650 = vmatmul.msk.bf16.gmra.mxu3 %vm248_vm1, %v3023_v14  ;;  %v835_v32 = vpop.f32.mrf.mxu2  ;;  %v648_v21 = vadd.f32 %v647_v9, %v3083_v49  ;;  %v1692_v9 = vld [vmem:[#allocation2 + $0x91] sm:$0xff] }
 0x179   : > { %v888_v55 = vadd.f32 %v835_v32, %v646_v40  ;;  %v1691_v40 = vld [vmem:[#allocation2 + $0x89] sm:$0xff] }
 0x17a   : > { %v1720_v51 = vpack.c.bf16 %v1692_v9, %v1691_v40 }
 0x17b   : > { %2667 = vmatmul.msk.bf16.gmra.mxu0 %vm248_vm1, %v3057_v33  ;;  %921 = vst.msk [vmem:[#allocation3 + $0x90] sm:$0xff] %vm902_vm3, %v888_v55  ;;  %v1141_v10 = vpop.f32.mrf.mxu3 }
 0x17c   : > { %v3323_v36 = vadd.f32 %v1281_v56, %v1141_v10 }
 0x17f   : > { %v650_v43 = vpop.f32.mrf.mxu1 }
 0x180   : > { %v1283_v4 = vpop.f32.mrf.mxu0  ;;  %v837_v17 = vpop.f32.mrf.mxu2  ;;  %v651_v29 = vadd.f32 %v650_v43, %v3101_v58 }
 0x181   : > { %v889_v23 = vadd.f32 %v837_v17, %v648_v21 }
 0x182   : > { %2617 = vmatmul.msk.bf16.gmra.mxu1 %vm248_vm1, %v3031_v19 }
 0x183   : > { %922 = vst.msk [vmem:[#allocation3 + $0x98] sm:$0xff] %vm902_vm3, %v889_v23  ;;  %v1143_v14 = vpop.f32.mrf.mxu3 }
 0x184   : > { %v3329_v24 = vadd.f32 %v1283_v4, %v1143_v14  ;;  %v1694_v14 = vld [vmem:[#allocation2 + $0xa9] sm:$0xff] }
 0x185   : > { %2635 = vmatmul.msk.bf16.gmra.mxu2 %vm248_vm1, %v1719_v47  ;;  %v1693_v47 = vld [vmem:[#allocation2 + $0xa1] sm:$0xff] }
 0x187   : > { %v652_v53 = vpop.f32.mrf.mxu1 }
 0x188   : > { %v1286_v0 = vpop.f32.mrf.mxu0  ;;  %2651 = vmatmul.msk.bf16.gmra.mxu3 %vm248_vm1, %v3037_v22  ;;  %v840_v49 = vpop.f32.mrf.mxu2  ;;  %v653_v56 = vadd.f32 %v652_v53, %v3111_v1 }
 0x189   : > { %v890_v62 = vadd.f32 %v840_v49, %v651_v29 }
 0x18b   : > { %2668 = vmatmul.msk.bf16.gmra.mxu0 %vm248_vm1, %v3085_v50  ;;  %923 = vst.msk [vmem:[#allocation3 + $0xa0] sm:$0xff] %vm902_vm3, %v890_v62  ;;  %v1146_v19 = vpop.f32.mrf.mxu3  ;;  %v1721_v62 = vpack.c.bf16 %v1694_v14, %v1693_v47 }
 0x18c   : > { %v3338_v7 = vadd.f32 %v1286_v0, %v1146_v19 }
 0x18f   : > { %v655_v58 = vpop.f32.mrf.mxu1 }
 0x190   : > { %v1288_v32 = vpop.f32.mrf.mxu0  ;;  %v842_v55 = vpop.f32.mrf.mxu2  ;;  %v656_v21 = vadd.f32 %v655_v58, %v3129_v11 }
 0x191   : > { %v891_v10 = vadd.f32 %v842_v55, %v653_v56  ;;  %v1695_v55 = vld [vmem:[#allocation2 + $0xb1] sm:$0xff] }
 0x192   : > { %2618 = vmatmul.msk.bf16.gmra.mxu1 %vm248_vm1, %v3057_v33 }
 0x193   : > { %924 = vst.msk [vmem:[#allocation3 + $0xa8] sm:$0xff] %vm902_vm3, %v891_v10  ;;  %v1148_v22 = vpop.f32.mrf.mxu3  ;;  %v1696_v10 = vld [vmem:[#allocation2 + $0xb9] sm:$0xff] }
 0x194   : > { %v3344_v8 = vadd.f32 %v1288_v32, %v1148_v22 }
 0x195   : > { %2636 = vmatmul.msk.bf16.gmra.mxu2 %vm248_vm1, %v1720_v51 }
 0x197   : > { %v657_v43 = vpop.f32.mrf.mxu1 }
 0x198   : > { %v1291_v4 = vpop.f32.mrf.mxu0  ;;  %2652 = vmatmul.msk.bf16.gmra.mxu3 %vm248_vm1, %v3065_v39  ;;  %v845_v1 = vpop.f32.mrf.mxu2  ;;  %v658_v29 = vadd.f32 %v657_v43, %v3137_v27 }
 0x199   : > { %v892_v17 = vadd.f32 %v845_v1, %v656_v21 }
 0x19b   : > { %2669 = vmatmul.msk.bf16.gmra.mxu0 %vm248_vm1, %v3113_v2  ;;  %925 = vst.msk [vmem:[#allocation3 + $0xb0] sm:$0xff] %vm902_vm3, %v892_v17  ;;  %v1151_v33 = vpop.f32.mrf.mxu3 }
 0x19c   : > { %v3353_v23 = vadd.f32 %v1291_v4, %v1151_v33  ;;  %v1722_v4 = vpack.c.bf16 %v1696_v10, %v1695_v55  ;;  %v1699_v10 = vld [vmem:[#allocation2 + $0xd9] sm:$0xff] }
 0x19f   : > { %v660_v11 = vpop.f32.mrf.mxu1 }
 0x1a0   : > { %v1293_v53 = vpop.f32.mrf.mxu0  ;;  %v847_v0 = vpop.f32.mrf.mxu2  ;;  %v661_v40 = vadd.f32 %v660_v11, %v3049_v26  ;;  %v1697_v11 = vld [vmem:[#allocation2 + $0xc9] sm:$0xff] }
 0x1a1   : > { %v893_v49 = vadd.f32 %v847_v0, %v658_v29 }
 0x1a2   : > { %2619 = vmatmul.msk.bf16.gmra.mxu1 %vm248_vm1, %v3085_v50 }
 0x1a3   : > { %926 = vst.msk [vmem:[#allocation3 + $0xb8] sm:$0xff] %vm902_vm3, %v893_v49  ;;  %v1153_v39 = vpop.f32.mrf.mxu3 }
 0x1a4   : > { %v3359_v19 = vadd.f32 %v1293_v53, %v1153_v39  ;;  %v1698_v53 = vld [vmem:[#allocation2 + $0xd1] sm:$0xff] }
 0x1a5   : > { %2637 = vmatmul.msk.bf16.gmra.mxu2 %vm248_vm1, %v1721_v62 }
 0x1a7   : > { %v662_v9 = vpop.f32.mrf.mxu1 }
 0x1a8   : > { %v1296_v56 = vpop.f32.mrf.mxu0  ;;  %2653 = vmatmul.msk.bf16.gmra.mxu3 %vm248_vm1, %v3093_v54  ;;  %v850_v27 = vpop.f32.mrf.mxu2  ;;  %v663_v51 = vadd.f32 %v662_v9, %v3061_v12 }
 0x1a9   : > { %v894_v58 = vadd.f32 %v850_v27, %v661_v40  ;;  %v1723_v40 = vpack.c.bf16 %v1698_v53, %v1697_v11  ;;  %v1702_v11 = vld [vmem:[#allocation2 + $0xf9] sm:$0xff]  ;;  %v3709_v53 = vld [vmem:[#allocation4_spill] sm:$0xff] }
 0x1ab   : > { %2670 = vmatmul.msk.bf16.gmra.mxu0 %vm248_vm1, %v3139_v28  ;;  %927 = vst.msk [vmem:[#allocation3 + $0xc0] sm:$0xff] %vm902_vm3, %v894_v58  ;;  %v1156_v50 = vpop.f32.mrf.mxu3 }
 0x1ac   : > { %v3368_v32 = vadd.f32 %v1296_v56, %v1156_v50 }
 0x1af   : > { %v665_v26 = vpop.f32.mrf.mxu1 }
 0x1b0   : > { %v1298_v22 = vpop.f32.mrf.mxu0  ;;  %v852_v21 = vpop.f32.mrf.mxu2  ;;  %v666_v17 = vadd.f32 %v665_v26, %v3077_v44 }
 0x1b1   : > { %v895_v43 = vadd.f32 %v852_v21, %v663_v51  ;;  %v1700_v51 = vld [vmem:[#allocation2 + $0xe1] sm:$0xff] }
 0x1b2   : > { %2620 = vmatmul.msk.bf16.gmra.mxu1 %vm248_vm1, %v3113_v2 }
 0x1b3   : > { %928 = vst.msk [vmem:[#allocation3 + $0xc8] sm:$0xff] %vm902_vm3, %v895_v43  ;;  %v1158_v54 = vpop.f32.mrf.mxu3 }
 0x1b4   : > { %v3374_v1 = vadd.f32 %v1298_v22, %v1158_v54 }
 0x1b5   : > { %2638 = vmatmul.msk.bf16.gmra.mxu2 %vm248_vm1, %v1722_v4  ;;  %v1724_v4 = vpack.c.bf16 %v1700_v51, %v1699_v10  ;;  %v3711_v10 = vld [vmem:[#allocation6_spill] sm:$0xff] }
 0x1b7   : > { %v667_v33 = vpop.f32.mrf.mxu1 }
 0x1b8   : > { %v1301_v47 = vpop.f32.mrf.mxu0  ;;  %2654 = vmatmul.msk.bf16.gmra.mxu3 %vm248_vm1, %v3121_v6  ;;  %v855_v12 = vpop.f32.mrf.mxu2  ;;  %v668_v0 = vadd.f32 %v667_v33, %v3089_v34 }
 0x1b9   : > { %v896_v14 = vadd.f32 %v855_v12, %v666_v17 }
 0x1bb   : > { %2671 = vmatmul.msk.bf16.gmra.mxu0 %vm248_vm1, %v3158_v15  ;;  %929 = vst.msk [vmem:[#allocation3 + $0xd0] sm:$0xff] %vm902_vm3, %v896_v14  ;;  %v1161_v2 = vpop.f32.mrf.mxu3 }
 0x1bc   : > { %v3383_v29 = vadd.f32 %v1301_v47, %v1161_v2  ;;  %v1701_v2 = vld [vmem:[#allocation2 + $0xf1] sm:$0xff] }
 0x1bf   : > { %v670_v44 = vpop.f32.mrf.mxu1 }
 0x1c0   : > { %v1303_v49 = vpop.f32.mrf.mxu0  ;;  %v857_v62 = vpop.f32.mrf.mxu2  ;;  %v671_v56 = vadd.f32 %v670_v44, %v3105_v59 }
 0x1c1   : > { %v897_v39 = vadd.f32 %v857_v62, %v668_v0  ;;  %v3710_v62 = vld [vmem:[#allocation5_spill] sm:$0xff] }
 0x1c2   : > { %2621 = vmatmul.msk.bf16.gmra.mxu1 %vm248_vm1, %v3139_v28 }
 0x1c3   : > { %930 = vst.msk [vmem:[#allocation3 + $0xd8] sm:$0xff] %vm902_vm3, %v897_v39  ;;  %v1163_v6 = vpop.f32.mrf.mxu3 }
 0x1c4   : > { %v3389_v9 = vadd.f32 %v1303_v49, %v1163_v6  ;;  %v1725_v6 = vpack.c.bf16 %v1702_v11, %v1701_v2 }
 0x1c5   : > { %2639 = vmatmul.msk.bf16.gmra.mxu2 %vm248_vm1, %v1723_v40  ;;  %v1538_v40 = vld [vmem:[#allocation3] sm:$0xff] }
 0x1c7   : > { %v672_v27 = vpop.f32.mrf.mxu1 }
 0x1c8   : > { %v1306_v58 = vpop.f32.mrf.mxu0  ;;  %2655 = vmatmul.msk.bf16.gmra.mxu3 %vm248_vm1, %v3148_v46  ;;  %v860_v34 = vpop.f32.mrf.mxu2  ;;  %v673_v26 = vadd.f32 %v672_v27, %v3117_v31 }
 0x1c9   : > { %v898_v50 = vadd.f32 %v860_v34, %v671_v56 }
 0x1cb   : > { %2672 = vmatmul.msk.bf16.gmra.mxu0 %vm248_vm1, %v3178_v5  ;;  %931 = vst.msk [vmem:[#allocation3 + $0xe0] sm:$0xff] %vm902_vm3, %v898_v50  ;;  %v1166_v28 = vpop.f32.mrf.mxu3 }
 0x1cc   : > { %v3398_v55 = vadd.f32 %v1306_v58, %v1166_v28 }
 0x1cf   : > { %v675_v59 = vpop.f32.mrf.mxu1 }
 0x1d0   : > { %v1308_v22 = vpop.f32.mrf.mxu0  ;;  %v862_v21 = vpop.f32.mrf.mxu2  ;;  %v676_v17 = vadd.f32 %v675_v59, %v3133_v13 }
 0x1d1   : > { %v899_v43 = vadd.f32 %v862_v21, %v673_v26 }
 0x1d2   : > { %2622 = vmatmul.msk.bf16.gmra.mxu1 %vm248_vm1, %v3158_v15 }
 0x1d3   : > { %932 = vst.msk [vmem:[#allocation3 + $0xe8] sm:$0xff] %vm902_vm3, %v899_v43  ;;  %v1168_v46 = vpop.f32.mrf.mxu3 }
 0x1d4   : > { %v3404_v54 = vadd.f32 %v1308_v22, %v1168_v46  ;;  %v1704_v46 = vld [vmem:[#allocation2 + $0x109] sm:$0xff] }
 0x1d5   : > { %2640 = vmatmul.msk.bf16.gmra.mxu2 %vm248_vm1, %v1724_v4  ;;  %v1703_v4 = vld [vmem:[#allocation2 + $0x101] sm:$0xff] }
 0x1d7   : > { %v677_v33 = vpop.f32.mrf.mxu1 }
 0x1d8   : > { %v1311_v47 = vpop.f32.mrf.mxu0  ;;  %2656 = vmatmul.msk.bf16.gmra.mxu3 %vm248_vm1, %v3168_v52  ;;  %v865_v31 = vpop.f32.mrf.mxu2  ;;  %v678_v0 = vadd.f32 %v677_v33, %v3709_v53 }
 0x1d9   : > { %v900_v12 = vadd.f32 %v865_v31, %v676_v17 }
 0x1db   : > { %2673 = vmatmul.msk.bf16.gmra.mxu0 %vm248_vm1, %v3198_v30  ;;  %933 = vst.msk [vmem:[#allocation3 + $0xf0] sm:$0xff] %vm902_vm3, %v900_v12  ;;  %v1171_v15 = vpop.f32.mrf.mxu3  ;;  %v1540_v12 = vld [vmem:[#allocation3 + $0x10] sm:$0xff] }
 0x1dc   : > { %v3413_v14 = vadd.f32 %v1311_v47, %v1171_v15  ;;  %v1726_v15 = vpack.c.bf16 %v1704_v46, %v1703_v4  ;;  %v1542_v4 = vld [vmem:[#allocation3 + $0x20] sm:$0xff] }
 0x1df   : > { %v1426_v13 = vpop.f32.mrf.mxu1 }
 0x1e0   : > { %v1313_v44 = vpop.f32.mrf.mxu0  ;;  %v867_v49 = vpop.f32.mrf.mxu2  ;;  %v1506_v52 = vadd.f32 %v1426_v13, %v3710_v62 }
 0x1e1   : > { %v901_v39 = vadd.f32 %v867_v49, %v678_v0 }
 0x1e2   : > { %v1570_v56 = vadd.f32 %v1538_v40, %v1506_v52  ;;  %2623 = vmatmul.msk.bf16.gmra.mxu1 %vm248_vm1, %v3178_v5  ;;  %v1539_v5 = vld [vmem:[#allocation3 + $0x8] sm:$0xff]  ;;  %v3712_v52 = vld [vmem:[#allocation7_spill] sm:$0xff] }
 0x1e3   : > { %934 = vst.msk [vmem:[#allocation3 + $0xf8] sm:$0xff] %vm902_vm3, %v901_v39  ;;  %v1173_v27 = vpop.f32.mrf.mxu3 }
 0x1e4   : > { %v3420_v58 = vadd.f32 %v1313_v44, %v1173_v27  ;;  %1602 = vst.msk [vmem:[#allocation3] sm:$0xff] %vm902_vm3, %v1570_v56 }
 0x1e5   : > { %2641 = vmatmul.msk.bf16.gmra.mxu2 %vm248_vm1, %v1725_v6  ;;  %v1541_v6 = vld [vmem:[#allocation3 + $0x18] sm:$0xff] }
 0x1e7   : > { %v1428_v34 = vpop.f32.mrf.mxu1 }
 0x1e8   : > { %v2125_v50 = vpop.f32.mrf.mxu0  ;;  %2657 = vmatmul.msk.bf16.gmra.mxu3 %vm248_vm1, %v3188_v3  ;;  %v1795_v28 = vpop.f32.mrf.mxu2  ;;  %v1507_v51 = vadd.f32 %v1428_v34, %v3711_v10  ;;  %v1705_v10 = vld [vmem:[#allocation2 + $0x119] sm:$0xff] }
 0x1ea   : > { %v1571_v26 = vadd.f32 %v1539_v5, %v1507_v51  ;;  %v1706_v51 = vld [vmem:[#allocation2 + $0x121] sm:$0xff] }
 0x1eb   : > { %2674 = vmatmul.msk.bf16.gmra.mxu0 %vm248_vm1, %v3223_v48  ;;  %v1935_v59 = vpop.f32.mrf.mxu3  ;;  %v2237_v21 = vld [vmem:[#allocation3] sm:$0xff] }
 0x1ec   : > { %v1936_v22 = vadd.f32 %v1935_v59, %v1795_v28  ;;  %1603 = vst.msk [vmem:[#allocation3 + $0x8] sm:$0xff] %vm902_vm3, %v1571_v26 }
 0x1ee   : > { %v2205_v43 = vadd.f32 %v2125_v50, %v1936_v22 }
 0x1ef   : > { %v1431_v3 = vpop.f32.mrf.mxu1 }
 0x1f0   : > { %v2269_v17 = vadd.f32 %v2237_v21, %v2205_v43  ;;  %v2127_v33 = vpop.f32.mrf.mxu0  ;;  %v1797_v47 = vpop.f32.mrf.mxu2  ;;  %v1508_v31 = vadd.f32 %v1431_v3, %v3175_v35  ;;  %v3441_v35 = vld [vmem:[%s3697_s2] ss:$0 sm:$0xff] }
 0x1f2   : > { %2301 = vst.msk [vmem:[#allocation3] sm:$0xff] %vm902_vm3, %v2269_v17  ;;  %v1572_v2 = vadd.f32 %v1540_v12, %v1508_v31  ;;  %2624 = vmatmul.msk.bf16.gmra.mxu1 %vm248_vm1, %v3198_v30 }
 0x1f3   : > { %v1937_v11 = vpop.f32.mrf.mxu3  ;;  %v2238_v0 = vld [vmem:[#allocation3 + $0x8] sm:$0xff] }
 0x1f4   : > { %v1938_v53 = vadd.f32 %v1937_v11, %v1797_v47  ;;  %1604 = vst.msk [vmem:[#allocation3 + $0x10] sm:$0xff] %vm902_vm3, %v1572_v2  ;;  %v3713_v11 = vld [vmem:[#allocation8_spill] sm:$0xff] }
 0x1f5   : > { %2642 = vmatmul.msk.bf16.gmra.mxu2 %vm248_vm1, %v1726_v15 }
 0x1f6   : > { %v2206_v13 = vadd.f32 %v2127_v33, %v1938_v53 }
 0x1f7   : > { %v1433_v44 = vpop.f32.mrf.mxu1 }
 0x1f8   : > { %v2270_v49 = vadd.f32 %v2238_v0, %v2206_v13  ;;  %v2130_v62 = vpop.f32.mrf.mxu0  ;;  %2658 = vmatmul.msk.bf16.gmra.mxu3 %vm248_vm1, %v3208_v16  ;;  %v1800_v30 = vpop.f32.mrf.mxu2  ;;  %v1509_v39 = vadd.f32 %v1433_v44, %v3712_v52  ;;  %v1543_v0 = vld [vmem:[#allocation3 + $0x28] sm:$0xff] }
 0x1f9   : > { %v2333_v40 = vld [vmem:[#allocation3] sm:$0xff] }
 0x1fa   : > { %v2369_v56 = vadd.f32 %v3441_v35, %v2333_v40  ;;  %2302 = vst.msk [vmem:[#allocation3 + $0x8] sm:$0xff] %vm902_vm3, %v2270_v49  ;;  %v1573_v27 = vadd.f32 %v1541_v6, %v1509_v39  ;;  %v1707_v6 = vld [vmem:[#allocation2 + $0x129] sm:$0xff] }
 0x1fb   : > { %2675 = vmatmul.msk.bf16.gmra.mxu0 %vm248_vm1, %v3248_v20  ;;  %v1940_v16 = vpop.f32.mrf.mxu3  ;;  %v2239_v50 = vld [vmem:[#allocation3 + $0x10] sm:$0xff]  ;;  %v1727_v20 = vpack.c.bf16 %v1706_v51, %v1705_v10 }
 0x1fc   : > { %2401 = vst.msk [vmem:[%s3449_s29] sm:$0xff] %vm902_vm3, %v2369_v56  ;;  %v1941_v34 = vadd.f32 %v1940_v16, %v1800_v30  ;;  %v1339_v30 = vld [vmem:[#allocation2 + $0x10a] sm:$0xff] }
 0x1fd   : > { %1605 = vst.msk [vmem:[#allocation3 + $0x18] sm:$0xff] %vm902_vm3, %v1573_v27  ;;  %v1708_v56 = vld [vmem:[#allocation2 + $0x131] sm:$0xff] }
 0x1fe   : > { %v2207_v28 = vadd.f32 %v2130_v62, %v1941_v34  ;;  %v1338_v62 = vld [vmem:[#allocation2 + $0x102] sm:$0xff]  ;;  %v1728_v51 = vpack.c.bf16 %v1708_v56, %v1707_v6 }
 0x1ff   : > { %v1436_v5 = vpop.f32.mrf.mxu1  ;;  %v1359_v40 = vpack.c.bf16 %v1339_v30, %v1338_v62 }
 0x200   : > { %v2271_v26 = vadd.f32 %v2239_v50, %v2207_v28  ;;  %v2132_v59 = vpop.f32.mrf.mxu0  ;;  %v1802_v22 = vpop.f32.mrf.mxu2  ;;  %v1510_v21 = vadd.f32 %v1436_v5, %v3195_v42  ;;  %v1544_v28 = vld [vmem:[#allocation3 + $0x30] sm:$0xff]  ;;  %v1657_v5 = vld [vmem:[#allocation2 + $0x128] sm:$0xff] }
 0x201   : > { %v2334_v43 = vld [vmem:[#allocation3 + $0x8] sm:$0xff] }
 0x202   : > { %v2370_v46 = vadd.f32 %v3441_v35, %v2334_v43  ;;  %2303 = vst.msk [vmem:[#allocation3 + $0x10] sm:$0xff] %vm902_vm3, %v2271_v26  ;;  %v1574_v3 = vadd.f32 %v1542_v4, %v1510_v21  ;;  %2625 = vmatmul.msk.bf16.gmra.mxu1 %vm248_vm1, %v3223_v48  ;;  %v1658_v26 = vld [vmem:[#allocation2 + $0x130] sm:$0xff] }
 0x203   : > { %v1942_v17 = vpop.f32.mrf.mxu3  ;;  %v1678_v4 = vpack.c.bf16 %v1658_v26, %v1657_v5 }
 0x204   : > { %2402 = vst.msk [vmem:[%s3449_s29 + $0x8] sm:$0xff] %vm902_vm3, %v2370_v46  ;;  %v1943_v33 = vadd.f32 %v1942_v17, %v1802_v22  ;;  %v2240_v47 = vld [vmem:[#allocation3 + $0x18] sm:$0xff] }
 0x205   : > { %1606 = vst.msk [vmem:[#allocation3 + $0x20] sm:$0xff] %vm902_vm3, %v1574_v3  ;;  %2643 = vmatmul.msk.bf16.gmra.mxu2 %vm248_vm1, %v1727_v20 }
 0x206   : > { %v2208_v42 = vadd.f32 %v2132_v59, %v1943_v33 }
 0x207   : > { %v1438_v31 = vpop.f32.mrf.mxu1 }
 0x208   : > { %v2272_v12 = vadd.f32 %v2240_v47, %v2208_v42  ;;  %v2135_v15 = vpop.f32.mrf.mxu0  ;;  %2659 = vmatmul.msk.bf16.gmra.mxu3 %vm248_vm1, %v3234_v25  ;;  %v1805_v2 = vpop.f32.mrf.mxu2  ;;  %v1511_v48 = vadd.f32 %v1438_v31, %v3713_v11  ;;  %v3714_v47 = vld [vmem:[#allocation9_spill] sm:$0xff] }
 0x209   : > { %v2335_v53 = vld [vmem:[#allocation3 + $0x10] sm:$0xff] }
 0x20a   : > { %v2371_v13 = vadd.f32 %v3441_v35, %v2335_v53  ;;  %2304 = vst.msk [vmem:[#allocation3 + $0x18] sm:$0xff] %vm902_vm3, %v2272_v12  ;;  %v1575_v44 = vadd.f32 %v1543_v0, %v1511_v48  ;;  %v1545_v12 = vld [vmem:[#allocation3 + $0x38] sm:$0xff]  ;;  %v1340_v48 = vld [vmem:[#allocation2 + $0x11a] sm:$0xff] }
 0x20b   : > { %2676 = vmatmul.msk.bf16.gmra.mxu0 %vm248_vm1, %v3265_v63  ;;  %v1945_v49 = vpop.f32.mrf.mxu3  ;;  %v1341_v53 = vld [vmem:[#allocation2 + $0x122] sm:$0xff] }
 0x20c   : > { %2403 = vst.msk [vmem:[%s3449_s29 + $0x10] sm:$0xff] %vm902_vm3, %v2371_v13  ;;  %v1946_v52 = vadd.f32 %v1945_v49, %v1805_v2  ;;  %v2241_v25 = vld [vmem:[#allocation3 + $0x20] sm:$0xff]  ;;  %v1360_v30 = vpack.c.bf16 %v1341_v53, %v1340_v48 }
 0x20d   : > { %1607 = vst.msk [vmem:[#allocation3 + $0x28] sm:$0xff] %vm902_vm3, %v1575_v44  ;;  %v1709_v44 = vld [vmem:[#allocation2 + $0x141] sm:$0xff]  ;;  %v1710_v49 = vld [vmem:[#allocation2 + $0x149] sm:$0xff]  ;;  %v1343_v53 = vld [vmem:[#allocation2 + $0x132] sm:$0xff] }
 0x20e   : > { %v2209_v39 = vadd.f32 %v2135_v15, %v1946_v52  ;;  %v243_v52 = vld [vmem:[%s2849_s7 + $0x168] sm:$0xff] }
 0x20f   : > { %v1441_v27 = vpop.f32.mrf.mxu1  ;;  %295 = vst.msk [vmem:[#allocation2 + $0x168] sm:$0xff] %vm248_vm1, %v243_v52  ;;  %v1342_v48 = vld [vmem:[#allocation2 + $0x12a] sm:$0xff]  ;;  %v246_v52 = vld [vmem:[%s2849_s7 + $0x180] sm:$0xff] }
 0x210   : > { %v2273_v16 = vadd.f32 %v2241_v25, %v2209_v39  ;;  %v2137_v34 = vpop.f32.mrf.mxu0  ;;  %v1807_v50 = vpop.f32.mrf.mxu2  ;;  %v1512_v63 = vadd.f32 %v1441_v27, %v3215_v38  ;;  %v244_v25 = vld [vmem:[%s2849_s7 + $0x170] sm:$0xff]  ;;  %v245_v39 = vld [vmem:[%s2849_s7 + $0x178] sm:$0xff]  ;;  %v3715_v27 = vld [vmem:[#allocation10_spill] sm:$0xff]  ;;  %298 = vst.msk [vmem:[#allocation2 + $0x180] sm:$0xff] %vm248_vm1, %v246_v52 }
 0x211   : > { %v2336_v10 = vld [vmem:[#allocation3 + $0x18] sm:$0xff]  ;;  %296 = vst.msk [vmem:[#allocation2 + $0x170] sm:$0xff] %vm248_vm1, %v244_v25 }
 0x212   : > { %v2372_v59 = vadd.f32 %v3441_v35, %v2336_v10  ;;  %2305 = vst.msk [vmem:[#allocation3 + $0x20] sm:$0xff] %vm902_vm3, %v2273_v16  ;;  %v1576_v22 = vadd.f32 %v1544_v28, %v1512_v63  ;;  %2626 = vmatmul.msk.bf16.gmra.mxu1 %vm248_vm1, %v1359_v40  ;;  %v1729_v63 = vpack.c.bf16 %v1710_v49, %v1709_v44  ;;  %v1659_v28 = vld [vmem:[#allocation2 + $0x140] sm:$0xff]  ;;  %v1660_v10 = vld [vmem:[#allocation2 + $0x148] sm:$0xff]  ;;  %v1711_v44 = vld [vmem:[#allocation2 + $0x151] sm:$0xff] }
 0x213   : > { %v1947_v21 = vpop.f32.mrf.mxu3  ;;  %297 = vst.msk [vmem:[#allocation2 + $0x178] sm:$0xff] %vm248_vm1, %v245_v39  ;;  %v247_v25 = vld [vmem:[%s2849_s7 + $0x188] sm:$0x3] }
 0x214   : > { %2404 = vst.msk [vmem:[%s3449_s29 + $0x18] sm:$0xff] %vm902_vm3, %v2372_v59  ;;  %v1948_v43 = vadd.f32 %v1947_v21, %v1807_v50  ;;  %v2242_v20 = vld [vmem:[#allocation3 + $0x28] sm:$0xff]  ;;  %v2039_v21 = vld [vmem:[#allocation2 + $0x142] sm:$0xff] }
 0x215   : > { %1608 = vst.msk [vmem:[#allocation3 + $0x30] sm:$0xff] %vm902_vm3, %v1576_v22  ;;  %2644 = vmatmul.msk.bf16.gmra.mxu2 %vm248_vm1, %v1728_v51  ;;  %v1679_v22 = vpack.c.bf16 %v1660_v10, %v1659_v28  ;;  %v1662_v28 = vld [vmem:[#allocation2 + $0x158] sm:$0xff] }
 0x216   : > { %v2210_v38 = vadd.f32 %v2137_v34, %v1948_v43  ;;  %v1546_v34 = vld [vmem:[#allocation3 + $0x40] sm:$0xff]  ;;  %299 = vst.msk [vmem:[#allocation2 + $0x188] sm:$0x3] %vm253_vm2, %v247_v25 }
 0x217   : > { %v1443_v46 = vpop.f32.mrf.mxu1  ;;  %v2040_v43 = vld [vmem:[#allocation2 + $0x14a] sm:$0xff] }
 0x218   : > { %v2274_v3 = vadd.f32 %v2242_v20, %v2210_v38  ;;  %v2140_v17 = vpop.f32.mrf.mxu0  ;;  %2660 = vmatmul.msk.bf16.gmra.mxu3 %vm248_vm1, %v1678_v4  ;;  %v1810_v33 = vpop.f32.mrf.mxu2  ;;  %v1513_v42 = vadd.f32 %v1443_v46, %v3714_v47  ;;  %v3508_v38 = vpack.c.bf16 %v2040_v43, %v2039_v21  ;;  %v3716_v47 = vld [vmem:[#allocation11_spill] sm:$0xff]  ;;  %v2042_v21 = vld [vmem:[#allocation2 + $0x15a] sm:$0xff] }
 0x219   : > { %v2337_v31 = vld [vmem:[#allocation3 + $0x20] sm:$0xff] }
 0x21a   : > { %v2373_v15 = vadd.f32 %v3441_v35, %v2337_v31  ;;  %2306 = vst.msk [vmem:[#allocation3 + $0x28] sm:$0xff] %vm902_vm3, %v2274_v3  ;;  %v1577_v2 = vadd.f32 %v1545_v12, %v1513_v42  ;;  %v1547_v12 = vld [vmem:[#allocation3 + $0x48] sm:$0xff] }
 0x21b   : > { %2677 = vmatmul.msk.bf16.gmra.mxu0 %vm248_vm1, %v3281_v18  ;;  %v1950_v11 = vpop.f32.mrf.mxu3 }
 0x21c   : > { %2405 = vst.msk [vmem:[%s3449_s29 + $0x20] sm:$0xff] %vm902_vm3, %v2373_v15  ;;  %v1951_v0 = vadd.f32 %v1950_v11, %v1810_v33  ;;  %v2243_v13 = vld [vmem:[#allocation3 + $0x30] sm:$0xff] }
 0x21d   : > { %1609 = vst.msk [vmem:[#allocation3 + $0x38] sm:$0xff] %vm902_vm3, %v1577_v2 }
 0x21e   : > { %v2211_v62 = vadd.f32 %v2140_v17, %v1951_v0 }
 0x21f   : > { %v1446_v40 = vpop.f32.mrf.mxu1 }
 0x220   : > { %v2275_v18 = vadd.f32 %v2243_v13, %v2211_v62  ;;  %v2142_v6 = vpop.f32.mrf.mxu0  ;;  %v1812_v56 = vpop.f32.mrf.mxu2  ;;  %v1514_v16 = vadd.f32 %v1446_v40, %v3715_v27  ;;  %v1361_v62 = vpack.c.bf16 %v1343_v53, %v1342_v48 }
 0x221   : > { %v2338_v50 = vld [vmem:[#allocation3 + $0x28] sm:$0xff] }
 0x222   : > { %v2374_v51 = vadd.f32 %v3441_v35, %v2338_v50  ;;  %2307 = vst.msk [vmem:[#allocation3 + $0x30] sm:$0xff] %vm902_vm3, %v2275_v18  ;;  %v1578_v5 = vadd.f32 %v1546_v34, %v1514_v16  ;;  %2627 = vmatmul.msk.bf16.gmra.mxu1 %vm248_vm1, %v1360_v30  ;;  %v1712_v30 = vld [vmem:[#allocation2 + $0x159] sm:$0xff] }
 0x223   : > { %v1952_v26 = vpop.f32.mrf.mxu3  ;;  %v1548_v16 = vld [vmem:[#allocation3 + $0x50] sm:$0xff]  ;;  %v1730_v50 = vpack.c.bf16 %v1712_v30, %v1711_v44  ;;  %v1714_v44 = vld [vmem:[#allocation2 + $0x171] sm:$0xff] }
 0x224   : > { %2406 = vst.msk [vmem:[%s3449_s29 + $0x28] sm:$0xff] %vm902_vm3, %v2374_v51  ;;  %v1953_v59 = vadd.f32 %v1952_v26, %v1812_v56  ;;  %v2244_v4 = vld [vmem:[#allocation3 + $0x38] sm:$0xff]  ;;  %v3717_v56 = vld [vmem:[#allocation12_spill] sm:$0xff] }
 0x225   : > { %1610 = vst.msk [vmem:[#allocation3 + $0x40] sm:$0xff] %vm902_vm3, %v1578_v5  ;;  %2645 = vmatmul.msk.bf16.gmra.mxu2 %vm248_vm1, %v1729_v63  ;;  %v1661_v63 = vld [vmem:[#allocation2 + $0x150] sm:$0xff] }
 0x226   : > { %v2212_v20 = vadd.f32 %v2142_v6, %v1953_v59  ;;  %v1680_v59 = vpack.c.bf16 %v1662_v28, %v1661_v63  ;;  %v2043_v28 = vld [vmem:[#allocation2 + $0x16a] sm:$0xff] }
 0x227   : > { %v1448_v46 = vpop.f32.mrf.mxu1 }
 0x228   : > { %v2276_v3 = vadd.f32 %v2244_v4, %v2212_v20  ;;  %v2145_v17 = vpop.f32.mrf.mxu0  ;;  %2661 = vmatmul.msk.bf16.gmra.mxu3 %vm248_vm1, %v1679_v22  ;;  %v1815_v33 = vpop.f32.mrf.mxu2  ;;  %v1515_v42 = vadd.f32 %v1448_v46, %v3716_v47  ;;  %v2041_v22 = vld [vmem:[#allocation2 + $0x152] sm:$0xff] }
 0x229   : > { %v2339_v31 = vld [vmem:[#allocation3 + $0x30] sm:$0xff]  ;;  %v3531_v20 = vpack.c.bf16 %v2042_v21, %v2041_v22  ;;  %v3718_v47 = vld [vmem:[#allocation13_spill] sm:$0xff] }
 0x22a   : > { %v2375_v15 = vadd.f32 %v3441_v35, %v2339_v31  ;;  %2308 = vst.msk [vmem:[#allocation3 + $0x38] sm:$0xff] %vm902_vm3, %v2276_v3  ;;  %v1579_v2 = vadd.f32 %v1547_v12, %v1515_v42  ;;  %v1549_v12 = vld [vmem:[#allocation3 + $0x58] sm:$0xff] }
 0x22b   : > { %2678 = vmatmul.msk.bf16.gmra.mxu0 %vm248_vm1, %v3508_v38  ;;  %v1955_v11 = vpop.f32.mrf.mxu3 }
 0x22c   : > { %2407 = vst.msk [vmem:[%s3449_s29 + $0x30] sm:$0xff] %vm902_vm3, %v2375_v15  ;;  %v1956_v0 = vadd.f32 %v1955_v11, %v1815_v33  ;;  %v2245_v13 = vld [vmem:[#allocation3 + $0x40] sm:$0xff] }
 0x22d   : > { %1611 = vst.msk [vmem:[#allocation3 + $0x48] sm:$0xff] %vm902_vm3, %v1579_v2 }
 0x22e   : > { %v2213_v49 = vadd.f32 %v2145_v17, %v1956_v0 }
 0x22f   : > { %v1451_v39 = vpop.f32.mrf.mxu1 }
 0x230   : > { %v2277_v40 = vadd.f32 %v2245_v13, %v2213_v49  ;;  %v2147_v18 = vpop.f32.mrf.mxu0  ;;  %v1817_v6 = vpop.f32.mrf.mxu2  ;;  %v1516_v27 = vadd.f32 %v1451_v39, %v3717_v56  ;;  %v1713_v13 = vld [vmem:[#allocation2 + $0x169] sm:$0xff] }
 0x231   : > { %v2340_v34 = vld [vmem:[#allocation3 + $0x38] sm:$0xff]  ;;  %v1550_v39 = vld [vmem:[#allocation3 + $0x60] sm:$0xff] }
 0x232   : > { %v2376_v10 = vadd.f32 %v3441_v35, %v2340_v34  ;;  %2309 = vst.msk [vmem:[#allocation3 + $0x40] sm:$0xff] %vm902_vm3, %v2277_v40  ;;  %v1580_v51 = vadd.f32 %v1548_v16, %v1516_v27  ;;  %2628 = vmatmul.msk.bf16.gmra.mxu1 %vm248_vm1, %v1361_v62  ;;  %v1664_v56 = vld [vmem:[#allocation2 + $0x170] sm:$0xff] }
 0x233   : > { %v1957_v5 = vpop.f32.mrf.mxu3 }
 0x234   : > { %2408 = vst.msk [vmem:[%s3449_s29 + $0x38] sm:$0xff] %vm902_vm3, %v2376_v10  ;;  %v1958_v26 = vadd.f32 %v1957_v5, %v1817_v6  ;;  %v2246_v43 = vld [vmem:[#allocation3 + $0x48] sm:$0xff]  ;;  %v1663_v6 = vld [vmem:[#allocation2 + $0x168] sm:$0xff] }
 0x235   : > { %1612 = vst.msk [vmem:[#allocation3 + $0x50] sm:$0xff] %vm902_vm3, %v1580_v51  ;;  %2646 = vmatmul.msk.bf16.gmra.mxu2 %vm248_vm1, %v1730_v50  ;;  %v1681_v63 = vpack.c.bf16 %v1664_v56, %v1663_v6 }
 0x236   : > { %v2214_v4 = vadd.f32 %v2147_v18, %v1958_v26  ;;  %v1731_v18 = vpack.c.bf16 %v1714_v44, %v1713_v13  ;;  %v1665_v44 = vld [vmem:[#allocation2 + $0x178] sm:$0xff] }
 0x237   : > { %v1453_v46 = vpop.f32.mrf.mxu1 }
 0x238   : > { %v2278_v3 = vadd.f32 %v2246_v43, %v2214_v4  ;;  %v2150_v17 = vpop.f32.mrf.mxu0  ;;  %2662 = vmatmul.msk.bf16.gmra.mxu3 %vm248_vm1, %v1680_v59  ;;  %v1820_v33 = vpop.f32.mrf.mxu2  ;;  %v1517_v42 = vadd.f32 %v1453_v46, %v3718_v47  ;;  %v1551_v4 = vld [vmem:[#allocation3 + $0x68] sm:$0xff] }
 0x239   : > { %v2341_v31 = vld [vmem:[#allocation3 + $0x40] sm:$0xff] }
 0x23a   : > { %v2377_v15 = vadd.f32 %v3441_v35, %v2341_v31  ;;  %2310 = vst.msk [vmem:[#allocation3 + $0x48] sm:$0xff] %vm902_vm3, %v2278_v3  ;;  %v1581_v2 = vadd.f32 %v1549_v12, %v1517_v42  ;;  %v1715_v31 = vld [vmem:[#allocation2 + $0x179] sm:$0xff]  ;;  %v1716_v12 = vld [vmem:[#allocation2 + $0x181] sm:$0xff] }
 0x23b   : > { %2679 = vmatmul.msk.bf16.gmra.mxu0 %vm248_vm1, %v3531_v20  ;;  %v1960_v11 = vpop.f32.mrf.mxu3  ;;  %v1732_v13 = vpack.c.bf16 %v1716_v12, %v1715_v31 }
 0x23c   : > { %2409 = vst.msk [vmem:[%s3449_s29 + $0x40] sm:$0xff] %vm902_vm3, %v2377_v15  ;;  %v1961_v48 = vadd.f32 %v1960_v11, %v1820_v33  ;;  %v2247_v53 = vld [vmem:[#allocation3 + $0x50] sm:$0xff] }
 0x23d   : > { %1613 = vst.msk [vmem:[#allocation3 + $0x58] sm:$0xff] %vm902_vm3, %v1581_v2 }
 0x23e   : > { %v2215_v0 = vadd.f32 %v2150_v17, %v1961_v48 }
 0x23f   : > { %v1456_v49 = vpop.f32.mrf.mxu1 }
 0x240   : > { %v2279_v62 = vadd.f32 %v2247_v53, %v2215_v0  ;;  %v2152_v30 = vpop.f32.mrf.mxu0  ;;  %v1822_v52 = vpop.f32.mrf.mxu2  ;;  %v1518_v25 = vadd.f32 %v1456_v49, %v3278_v61  ;;  %v2044_v61 = vld [vmem:[#allocation2 + $0x172] sm:$0xff]  ;;  %v1552_v53 = vld [vmem:[#allocation3 + $0x70] sm:$0xff] }
 0x241   : > { %v2342_v40 = vld [vmem:[#allocation3 + $0x48] sm:$0xff]  ;;  %v2061_v5 = vpack.c.bf16 %v2044_v61, %v2043_v28  ;;  %v1666_v49 = vld [vmem:[#allocation2 + $0x180] sm:$0xff]  ;;  %v1553_v28 = vld [vmem:[#allocation3 + $0x78] sm:$0xff] }
 0x242   : > { %v2378_v27 = vadd.f32 %v3441_v35, %v2342_v40  ;;  %2311 = vst.msk [vmem:[#allocation3 + $0x50] sm:$0xff] %vm902_vm3, %v2279_v62  ;;  %v1582_v16 = vadd.f32 %v1550_v39, %v1518_v25  ;;  %2629 = vmatmul.msk.bf16.gmra.mxu1 %vm248_vm1, %v3508_v38  ;;  %v1682_v39 = vpack.c.bf16 %v1666_v49, %v1665_v44  ;;  %v2045_v40 = vld [vmem:[#allocation2 + $0x17a] sm:$0xff] }
 0x243   : > { %v1962_v34 = vpop.f32.mrf.mxu3 }
 0x244   : > { %2410 = vst.msk [vmem:[%s3449_s29 + $0x48] sm:$0xff] %vm902_vm3, %v2378_v27  ;;  %v1963_v50 = vadd.f32 %v1962_v34, %v1822_v52  ;;  %v2248_v10 = vld [vmem:[#allocation3 + $0x58] sm:$0xff] }
 0x245   : > { %1614 = vst.msk [vmem:[#allocation3 + $0x60] sm:$0xff] %vm902_vm3, %v1582_v16  ;;  %2647 = vmatmul.msk.bf16.gmra.mxu2 %vm248_vm1, %v1731_v18 }
 0x246   : > { %v2216_v51 = vadd.f32 %v2152_v30, %v1963_v50 }
 0x247   : > { %v1458_v26 = vpop.f32.mrf.mxu1 }
 0x248   : > { %v2280_v59 = vadd.f32 %v2248_v10, %v2216_v51  ;;  %v2155_v22 = vpop.f32.mrf.mxu0  ;;  %2663 = vmatmul.msk.bf16.gmra.mxu3 %vm248_vm1, %v1681_v63  ;;  %v1825_v38 = vpop.f32.mrf.mxu2  ;;  %v1519_v21 = vadd.f32 %v1458_v26, %v3285_v37 }
 0x249   : > { %v2343_v43 = vld [vmem:[#allocation3 + $0x50] sm:$0xff] }
 0x24a   : > { %v2379_v46 = vadd.f32 %v3441_v35, %v2343_v43  ;;  %2312 = vst.msk [vmem:[#allocation3 + $0x58] sm:$0xff] %vm902_vm3, %v2280_v59  ;;  %v1583_v3 = vadd.f32 %v1551_v4, %v1519_v21 }
 0x24b   : > { %2680 = vmatmul.msk.bf16.gmra.mxu0 %vm248_vm1, %v2061_v5  ;;  %v1965_v17 = vpop.f32.mrf.mxu3 }
 0x24c   : > { %2411 = vst.msk [vmem:[%s3449_s29 + $0x50] sm:$0xff] %vm902_vm3, %v2379_v46  ;;  %v1966_v33 = vadd.f32 %v1965_v17, %v1825_v38  ;;  %v2249_v47 = vld [vmem:[#allocation3 + $0x60] sm:$0xff] }
 0x24d   : > { %1615 = vst.msk [vmem:[#allocation3 + $0x68] sm:$0xff] %vm902_vm3, %v1583_v3  ;;  %v1554_v46 = vld [vmem:[#allocation3 + $0x80] sm:$0xff] }
 0x24e   : > { %v2217_v42 = vadd.f32 %v2155_v22, %v1966_v33 }
 0x24f   : > { %v1461_v37 = vpop.f32.mrf.mxu1 }
 0x250   : > { %v2281_v15 = vadd.f32 %v2249_v47, %v2217_v42  ;;  %v2157_v2 = vpop.f32.mrf.mxu0  ;;  %v1827_v11 = vpop.f32.mrf.mxu2  ;;  %v1520_v48 = vadd.f32 %v1461_v37, %v3293_v45  ;;  %v2046_v45 = vld [vmem:[#allocation2 + $0x182] sm:$0xff] }
 0x251   : > { %v2344_v0 = vld [vmem:[#allocation3 + $0x58] sm:$0xff]  ;;  %v2062_v56 = vpack.c.bf16 %v2046_v45, %v2045_v40  ;;  %v1556_v45 = vld [vmem:[#allocation3 + $0x90] sm:$0xff] }
 0x252   : > { %v2380_v62 = vadd.f32 %v3441_v35, %v2344_v0  ;;  %2313 = vst.msk [vmem:[#allocation3 + $0x60] sm:$0xff] %vm902_vm3, %v2281_v15  ;;  %v1584_v30 = vadd.f32 %v1552_v53, %v1520_v48  ;;  %2630 = vmatmul.msk.bf16.gmra.mxu1 %vm248_vm1, %v3531_v20  ;;  %v1555_v48 = vld [vmem:[#allocation3 + $0x88] sm:$0xff] }
 0x253   : > { %v1967_v52 = vpop.f32.mrf.mxu3 }
 0x254   : > { %2412 = vst.msk [vmem:[%s3449_s29 + $0x58] sm:$0xff] %vm902_vm3, %v2380_v62  ;;  %v1968_v25 = vadd.f32 %v1967_v52, %v1827_v11  ;;  %v2250_v18 = vld [vmem:[#allocation3 + $0x68] sm:$0xff] }
 0x255   : > { %1616 = vst.msk [vmem:[#allocation3 + $0x70] sm:$0xff] %vm902_vm3, %v1584_v30  ;;  %2648 = vmatmul.msk.bf16.gmra.mxu2 %vm248_vm1, %v1732_v13 }
 0x256   : > { %v2218_v6 = vadd.f32 %v2157_v2, %v1968_v25 }
 0x257   : > { %v1463_v27 = vpop.f32.mrf.mxu1 }
 0x258   : > { %v2282_v16 = vadd.f32 %v2250_v18, %v2218_v6  ;;  %v2160_v34 = vpop.f32.mrf.mxu0  ;;  %2664 = vmatmul.msk.bf16.gmra.mxu3 %vm248_vm1, %v1682_v39  ;;  %v1830_v20 = vpop.f32.mrf.mxu2  ;;  %v1521_v50 = vadd.f32 %v1463_v27, %v3299_v57 }
 0x259   : > { %v2345_v63 = vld [vmem:[#allocation3 + $0x60] sm:$0xff] }
 0x25a   : > { %v2381_v61 = vadd.f32 %v3441_v35, %v2345_v63  ;;  %2314 = vst.msk [vmem:[#allocation3 + $0x68] sm:$0xff] %vm902_vm3, %v2282_v16  ;;  %v1585_v10 = vadd.f32 %v1553_v28, %v1521_v50 }
 0x25b   : > { %2681 = vmatmul.msk.bf16.gmra.mxu0 %vm248_vm1, %v2062_v56  ;;  %v1970_v51 = vpop.f32.mrf.mxu3 }
 0x25c   : > { %2413 = vst.msk [vmem:[%s3449_s29 + $0x60] sm:$0xff] %vm902_vm3, %v2381_v61  ;;  %v1971_v5 = vadd.f32 %v1970_v51, %v1830_v20  ;;  %v2251_v26 = vld [vmem:[#allocation3 + $0x70] sm:$0xff] }
 0x25d   : > { %1617 = vst.msk [vmem:[#allocation3 + $0x78] sm:$0xff] %vm902_vm3, %v1585_v10  ;;  %v1557_v10 = vld [vmem:[#allocation3 + $0x98] sm:$0xff] }
 0x25e   : > { %v2219_v59 = vadd.f32 %v2160_v34, %v1971_v5 }
 0x25f   : > { %v1466_v22 = vpop.f32.mrf.mxu1 }
 0x260   : > { %v2283_v57 = vadd.f32 %v2251_v26, %v2219_v59  ;;  %v2162_v38 = vpop.f32.mrf.mxu0  ;;  %v1832_v21 = vpop.f32.mrf.mxu2  ;;  %v1522_v43 = vadd.f32 %v1466_v22, %v3308_v41 }
 0x261   : > { %v2346_v4 = vld [vmem:[#allocation3 + $0x68] sm:$0xff] }
 0x262   : > { %v2382_v3 = vadd.f32 %v3441_v35, %v2346_v4  ;;  %2315 = vst.msk [vmem:[#allocation3 + $0x70] sm:$0xff] %vm902_vm3, %v2283_v57  ;;  %v1586_v17 = vadd.f32 %v1554_v46, %v1522_v43 }
 0x263   : > { %v1972_v33 = vpop.f32.mrf.mxu3 }
 0x264   : > { %2414 = vst.msk [vmem:[%s3449_s29 + $0x68] sm:$0xff] %vm902_vm3, %v2382_v3  ;;  %v1973_v47 = vadd.f32 %v1972_v33, %v1832_v21  ;;  %v2252_v42 = vld [vmem:[#allocation3 + $0x78] sm:$0xff]  ;;  %v1558_v3 = vld [vmem:[#allocation3 + $0xa0] sm:$0xff] }
 0x265   : > { %1618 = vst.msk [vmem:[#allocation3 + $0x80] sm:$0xff] %vm902_vm3, %v1586_v17 }
 0x266   : > { %v2220_v31 = vadd.f32 %v2162_v38, %v1973_v47 }
 0x267   : > { %v1468_v12 = vpop.f32.mrf.mxu1 }
 0x268   : > { %v2284_v37 = vadd.f32 %v2252_v42, %v2220_v31  ;;  %v2165_v15 = vpop.f32.mrf.mxu0  ;;  %v1835_v41 = vpop.f32.mrf.mxu2  ;;  %v1523_v2 = vadd.f32 %v1468_v12, %v3314_v60 }
 0x269   : > { %v2347_v11 = vld [vmem:[#allocation3 + $0x70] sm:$0xff] }
 0x26a   : > { %v2383_v53 = vadd.f32 %v3441_v35, %v2347_v11  ;;  %2316 = vst.msk [vmem:[#allocation3 + $0x78] sm:$0xff] %vm902_vm3, %v2284_v37  ;;  %v1587_v0 = vadd.f32 %v1555_v48, %v1523_v2  ;;  %v1559_v48 = vld [vmem:[#allocation3 + $0xa8] sm:$0xff] }
 0x26b   : > { %v1975_v13 = vpop.f32.mrf.mxu3 }
 0x26c   : > { %2415 = vst.msk [vmem:[%s3449_s29 + $0x70] sm:$0xff] %vm902_vm3, %v2383_v53  ;;  %v1976_v44 = vadd.f32 %v1975_v13, %v1835_v41  ;;  %v2253_v49 = vld [vmem:[#allocation3 + $0x80] sm:$0xff] }
 0x26d   : > { %1619 = vst.msk [vmem:[#allocation3 + $0x88] sm:$0xff] %vm902_vm3, %v1587_v0 }
 0x26e   : > { %v2221_v62 = vadd.f32 %v2165_v15, %v1976_v44 }
 0x26f   : > { %v1471_v30 = vpop.f32.mrf.mxu1 }
 0x270   : > { %v2285_v52 = vadd.f32 %v2253_v49, %v2221_v62  ;;  %v2167_v25 = vpop.f32.mrf.mxu0  ;;  %v1837_v60 = vpop.f32.mrf.mxu2  ;;  %v1524_v39 = vadd.f32 %v1471_v30, %v3323_v36 }
 0x271   : > { %v2348_v40 = vld [vmem:[#allocation3 + $0x78] sm:$0xff] }
 0x272   : > { %v2384_v18 = vadd.f32 %v3441_v35, %v2348_v40  ;;  %2317 = vst.msk [vmem:[#allocation3 + $0x80] sm:$0xff] %vm902_vm3, %v2285_v52  ;;  %v1588_v6 = vadd.f32 %v1556_v45, %v1524_v39  ;;  %v1560_v40 = vld [vmem:[#allocation3 + $0xb0] sm:$0xff] }
 0x273   : > { %v1977_v56 = vpop.f32.mrf.mxu3 }
 0x274   : > { %2416 = vst.msk [vmem:[%s3449_s29 + $0x78] sm:$0xff] %vm902_vm3, %v2384_v18  ;;  %v1978_v27 = vadd.f32 %v1977_v56, %v1837_v60  ;;  %v2254_v16 = vld [vmem:[#allocation3 + $0x88] sm:$0xff] }
 0x275   : > { %1620 = vst.msk [vmem:[#allocation3 + $0x90] sm:$0xff] %vm902_vm3, %v1588_v6 }
 0x276   : > { %v2222_v34 = vadd.f32 %v2167_v25, %v1978_v27 }
 0x277   : > { %v1473_v20 = vpop.f32.mrf.mxu1 }
 0x278   : > { %v2286_v50 = vadd.f32 %v2254_v16, %v2222_v34  ;;  %v2170_v63 = vpop.f32.mrf.mxu0  ;;  %v1840_v36 = vpop.f32.mrf.mxu2  ;;  %v1525_v28 = vadd.f32 %v1473_v20, %v3329_v24 }
 0x279   : > { %v2349_v61 = vld [vmem:[#allocation3 + $0x80] sm:$0xff] }
 0x27a   : > { %v2385_v51 = vadd.f32 %v3441_v35, %v2349_v61  ;;  %2318 = vst.msk [vmem:[#allocation3 + $0x88] sm:$0xff] %vm902_vm3, %v2286_v50  ;;  %v1589_v5 = vadd.f32 %v1557_v10, %v1525_v28  ;;  %v1561_v28 = vld [vmem:[#allocation3 + $0xb8] sm:$0xff] }
 0x27b   : > { %v1980_v26 = vpop.f32.mrf.mxu3 }
 0x27c   : > { %2417 = vst.msk [vmem:[%s3449_s29 + $0x80] sm:$0xff] %vm902_vm3, %v2385_v51  ;;  %v1981_v59 = vadd.f32 %v1980_v26, %v1840_v36  ;;  %v2255_v22 = vld [vmem:[#allocation3 + $0x90] sm:$0xff] }
 0x27d   : > { %1621 = vst.msk [vmem:[#allocation3 + $0x98] sm:$0xff] %vm902_vm3, %v1589_v5 }
 0x27e   : > { %v2223_v57 = vadd.f32 %v2170_v63, %v1981_v59 }
 0x27f   : > { %v1476_v38 = vpop.f32.mrf.mxu1 }
 0x280   : > { %v2287_v21 = vadd.f32 %v2255_v22, %v2223_v57  ;;  %v2172_v43 = vpop.f32.mrf.mxu0  ;;  %v1842_v24 = vpop.f32.mrf.mxu2  ;;  %v1526_v4 = vadd.f32 %v1476_v38, %v3338_v7 }
 0x281   : > { %v2350_v46 = vld [vmem:[#allocation3 + $0x88] sm:$0xff] }
 0x282   : > { %v2386_v17 = vadd.f32 %v3441_v35, %v2350_v46  ;;  %2319 = vst.msk [vmem:[#allocation3 + $0x90] sm:$0xff] %vm902_vm3, %v2287_v21  ;;  %v1590_v33 = vadd.f32 %v1558_v3, %v1526_v4 }
 0x283   : > { %v1982_v47 = vpop.f32.mrf.mxu3 }
 0x284   : > { %2418 = vst.msk [vmem:[%s3449_s29 + $0x88] sm:$0xff] %vm902_vm3, %v2386_v17  ;;  %v1983_v42 = vadd.f32 %v1982_v47, %v1842_v24  ;;  %v2256_v31 = vld [vmem:[#allocation3 + $0x98] sm:$0xff]  ;;  %v1562_v24 = vld [vmem:[#allocation3 + $0xc0] sm:$0xff] }
 0x285   : > { %1622 = vst.msk [vmem:[#allocation3 + $0xa0] sm:$0xff] %vm902_vm3, %v1590_v33 }
 0x286   : > { %v2224_v12 = vadd.f32 %v2172_v43, %v1983_v42 }
 0x287   : > { %v1478_v37 = vpop.f32.mrf.mxu1 }
 0x288   : > { %v2288_v15 = vadd.f32 %v2256_v31, %v2224_v12  ;;  %v2175_v41 = vpop.f32.mrf.mxu0  ;;  %v1845_v7 = vpop.f32.mrf.mxu2  ;;  %v1527_v2 = vadd.f32 %v1478_v37, %v3344_v8 }
 0x289   : > { %v2351_v11 = vld [vmem:[#allocation3 + $0x90] sm:$0xff] }
 0x28a   : > { %v2387_v53 = vadd.f32 %v3441_v35, %v2351_v11  ;;  %2320 = vst.msk [vmem:[#allocation3 + $0x98] sm:$0xff] %vm902_vm3, %v2288_v15  ;;  %v1591_v0 = vadd.f32 %v1559_v48, %v1527_v2 }
 0x28b   : > { %v1985_v13 = vpop.f32.mrf.mxu3 }
 0x28c   : > { %2419 = vst.msk [vmem:[%s3449_s29 + $0x90] sm:$0xff] %vm902_vm3, %v2387_v53  ;;  %v1986_v44 = vadd.f32 %v1985_v13, %v1845_v7  ;;  %v2257_v49 = vld [vmem:[#allocation3 + $0xa0] sm:$0xff] }
 0x28d   : > { %1623 = vst.msk [vmem:[#allocation3 + $0xa8] sm:$0xff] %vm902_vm3, %v1591_v0 }
 0x28e   : > { %v2225_v62 = vadd.f32 %v2175_v41, %v1986_v44  ;;  %v1563_v41 = vld [vmem:[#allocation3 + $0xc8] sm:$0xff] }
 0x28f   : > { %v1481_v30 = vpop.f32.mrf.mxu1 }
 0x290   : > { %v2289_v52 = vadd.f32 %v2257_v49, %v2225_v62  ;;  %v2177_v25 = vpop.f32.mrf.mxu0  ;;  %v1847_v8 = vpop.f32.mrf.mxu2  ;;  %v1528_v60 = vadd.f32 %v1481_v30, %v3353_v23 }
 0x291   : > { %v2352_v39 = vld [vmem:[#allocation3 + $0x98] sm:$0xff] }
 0x292   : > { %v2388_v45 = vadd.f32 %v3441_v35, %v2352_v39  ;;  %2321 = vst.msk [vmem:[#allocation3 + $0xa0] sm:$0xff] %vm902_vm3, %v2289_v52  ;;  %v1592_v18 = vadd.f32 %v1560_v40, %v1528_v60  ;;  %v1564_v52 = vld [vmem:[#allocation3 + $0xd0] sm:$0xff] }
 0x293   : > { %v1987_v6 = vpop.f32.mrf.mxu3 }
 0x294   : > { %2420 = vst.msk [vmem:[%s3449_s29 + $0x98] sm:$0xff] %vm902_vm3, %v2388_v45  ;;  %v1988_v56 = vadd.f32 %v1987_v6, %v1847_v8  ;;  %v2258_v27 = vld [vmem:[#allocation3 + $0xa8] sm:$0xff] }
 0x295   : > { %1624 = vst.msk [vmem:[#allocation3 + $0xb0] sm:$0xff] %vm902_vm3, %v1592_v18 }
 0x296   : > { %v2226_v16 = vadd.f32 %v2177_v25, %v1988_v56 }
 0x297   : > { %v1483_v34 = vpop.f32.mrf.mxu1 }
 0x298   : > { %v2290_v20 = vadd.f32 %v2258_v27, %v2226_v16  ;;  %v2180_v50 = vpop.f32.mrf.mxu0  ;;  %v1850_v23 = vpop.f32.mrf.mxu2  ;;  %v1529_v63 = vadd.f32 %v1483_v34, %v3359_v19  ;;  %v1565_v34 = vld [vmem:[#allocation3 + $0xd8] sm:$0xff] }
 0x299   : > { %v2353_v36 = vld [vmem:[#allocation3 + $0xa0] sm:$0xff] }
 0x29a   : > { %v2389_v61 = vadd.f32 %v3441_v35, %v2353_v36  ;;  %2322 = vst.msk [vmem:[#allocation3 + $0xa8] sm:$0xff] %vm902_vm3, %v2290_v20  ;;  %v1593_v10 = vadd.f32 %v1561_v28, %v1529_v63 }
 0x29b   : > { %v1990_v51 = vpop.f32.mrf.mxu3 }
 0x29c   : > { %2421 = vst.msk [vmem:[%s3449_s29 + $0xa0] sm:$0xff] %vm902_vm3, %v2389_v61  ;;  %v1991_v5 = vadd.f32 %v1990_v51, %v1850_v23  ;;  %v2259_v26 = vld [vmem:[#allocation3 + $0xb0] sm:$0xff] }
 0x29d   : > { %1625 = vst.msk [vmem:[#allocation3 + $0xb8] sm:$0xff] %vm902_vm3, %v1593_v10 }
 0x29e   : > { %v2227_v59 = vadd.f32 %v2180_v50, %v1991_v5 }
 0x29f   : > { %v1486_v22 = vpop.f32.mrf.mxu1 }
 0x2a0   : > { %v2291_v57 = vadd.f32 %v2259_v26, %v2227_v59  ;;  %v2182_v38 = vpop.f32.mrf.mxu0  ;;  %v1852_v19 = vpop.f32.mrf.mxu2  ;;  %v1530_v21 = vadd.f32 %v1486_v22, %v3368_v32  ;;  %v1566_v59 = vld [vmem:[#allocation3 + $0xe0] sm:$0xff] }
 0x2a1   : > { %v2354_v43 = vld [vmem:[#allocation3 + $0xa8] sm:$0xff] }
 0x2a2   : > { %v2390_v4 = vadd.f32 %v3441_v35, %v2354_v43  ;;  %2323 = vst.msk [vmem:[#allocation3 + $0xb0] sm:$0xff] %vm902_vm3, %v2291_v57  ;;  %v1594_v46 = vadd.f32 %v1562_v24, %v1530_v21 }
 0x2a3   : > { %v1992_v3 = vpop.f32.mrf.mxu3 }
 0x2a4   : > { %2422 = vst.msk [vmem:[%s3449_s29 + $0xa8] sm:$0xff] %vm902_vm3, %v2390_v4  ;;  %v1993_v17 = vadd.f32 %v1992_v3, %v1852_v19  ;;  %v2260_v33 = vld [vmem:[#allocation3 + $0xb8] sm:$0xff] }
 0x2a5   : > { %1626 = vst.msk [vmem:[#allocation3 + $0xc0] sm:$0xff] %vm902_vm3, %v1594_v46 }
 0x2a6   : > { %v2228_v47 = vadd.f32 %v2182_v38, %v1993_v17 }
 0x2a7   : > { %v1488_v42 = vpop.f32.mrf.mxu1 }
 0x2a8   : > { %v2292_v31 = vadd.f32 %v2260_v33, %v2228_v47  ;;  %v2185_v12 = vpop.f32.mrf.mxu0  ;;  %v1855_v32 = vpop.f32.mrf.mxu2  ;;  %v1531_v37 = vadd.f32 %v1488_v42, %v3374_v1  ;;  %v2729_v33 = vld [vmem:[%s3697_s2] ss:$0 sm:$0xff] }
 0x2a9   : > { %v2355_v15 = vld [vmem:[#allocation3 + $0xb0] sm:$0xff] }
 0x2aa   : > { %v2391_v7 = vadd.f32 %v3441_v35, %v2355_v15  ;;  %2324 = vst.msk [vmem:[#allocation3 + $0xb8] sm:$0xff] %vm902_vm3, %v2292_v31  ;;  %v1595_v2 = vadd.f32 %v1563_v41, %v1531_v37 }
 0x2ab   : > { %v1995_v11 = vpop.f32.mrf.mxu3 }
 0x2ac   : > { %2423 = vst.msk [vmem:[%s3449_s29 + $0xb0] sm:$0xff] %vm902_vm3, %v2391_v7  ;;  %v1996_v48 = vadd.f32 %v1995_v11, %v1855_v32  ;;  %v2261_v53 = vld [vmem:[#allocation3 + $0xc0] sm:$0xff] }
 0x2ad   : > { %1627 = vst.msk [vmem:[#allocation3 + $0xc8] sm:$0xff] %vm902_vm3, %v1595_v2 }
 0x2ae   : > { %v2229_v0 = vadd.f32 %v2185_v12, %v1996_v48  ;;  %v1568_v48 = vld [vmem:[#allocation3 + $0xf0] sm:$0xff] }
 0x2af   : > { %v1491_v13 = vpop.f32.mrf.mxu1 }
 0x2b0   : > { %v2293_v44 = vadd.f32 %v2261_v53, %v2229_v0  ;;  %v2187_v49 = vpop.f32.mrf.mxu0  ;;  %v1857_v1 = vpop.f32.mrf.mxu2  ;;  %v1532_v62 = vadd.f32 %v1491_v13, %v3383_v29 }
 0x2b1   : > { %v2356_v30 = vld [vmem:[#allocation3 + $0xb8] sm:$0xff] }
 0x2b2   : > { %v2392_v25 = vadd.f32 %v3441_v35, %v2356_v30  ;;  %2325 = vst.msk [vmem:[#allocation3 + $0xc0] sm:$0xff] %vm902_vm3, %v2293_v44  ;;  %v1596_v8 = vadd.f32 %v1564_v52, %v1532_v62 }
 0x2b3   : > { %v1997_v60 = vpop.f32.mrf.mxu3 }
 0x2b4   : > { %2424 = vst.msk [vmem:[%s3449_s29 + $0xb8] sm:$0xff] %vm902_vm3, %v2392_v25  ;;  %v1998_v39 = vadd.f32 %v1997_v60, %v1857_v1  ;;  %v2262_v40 = vld [vmem:[#allocation3 + $0xc8] sm:$0xff] }
 0x2b5   : > { %1628 = vst.msk [vmem:[#allocation3 + $0xd0] sm:$0xff] %vm902_vm3, %v1596_v8  ;;  %v1569_v8 = vld [vmem:[#allocation3 + $0xf8] sm:$0xff] }
 0x2b6   : > { %v2230_v45 = vadd.f32 %v2187_v49, %v1998_v39 }
 0x2b7   : > { %v1493_v18 = vpop.f32.mrf.mxu1 }
 0x2b8   : > { %v2294_v6 = vadd.f32 %v2262_v40, %v2230_v45  ;;  %v2190_v56 = vpop.f32.mrf.mxu0  ;;  %v1860_v29 = vpop.f32.mrf.mxu2  ;;  %v1533_v27 = vadd.f32 %v1493_v18, %v3389_v9 }
 0x2b9   : > { %v2357_v16 = vld [vmem:[#allocation3 + $0xc0] sm:$0xff] }
 0x2ba   : > { %v2393_v20 = vadd.f32 %v3441_v35, %v2357_v16  ;;  %2326 = vst.msk [vmem:[#allocation3 + $0xc8] sm:$0xff] %vm902_vm3, %v2294_v6  ;;  %v1597_v50 = vadd.f32 %v1565_v34, %v1533_v27 }
 0x2bb   : > { %v2000_v23 = vpop.f32.mrf.mxu3 }
 0x2bc   : > { %2425 = vst.msk [vmem:[%s3449_s29 + $0xc0] sm:$0xff] %vm902_vm3, %v2393_v20  ;;  %v2001_v63 = vadd.f32 %v2000_v23, %v1860_v29  ;;  %v2263_v36 = vld [vmem:[#allocation3 + $0xd0] sm:$0xff] }
 0x2bd   : > { %1629 = vst.msk [vmem:[#allocation3 + $0xd8] sm:$0xff] %vm902_vm3, %v1597_v50 }
 0x2be   : > { %v2231_v28 = vadd.f32 %v2190_v56, %v2001_v63 }
 0x2bf   : > { %v1496_v61 = vpop.f32.mrf.mxu1 }
 0x2c0   : > { %v2295_v10 = vadd.f32 %v2263_v36, %v2231_v28  ;;  %v2192_v51 = vpop.f32.mrf.mxu0  ;;  %v1862_v9 = vpop.f32.mrf.mxu2  ;;  %v1534_v5 = vadd.f32 %v1496_v61, %v3398_v55 }
 0x2c1   : > { %v2358_v26 = vld [vmem:[#allocation3 + $0xc8] sm:$0xff] }
 0x2c2   : > { %v2394_v22 = vadd.f32 %v3441_v35, %v2358_v26  ;;  %2327 = vst.msk [vmem:[#allocation3 + $0xd0] sm:$0xff] %vm902_vm3, %v2295_v10  ;;  %v1598_v57 = vadd.f32 %v1566_v59, %v1534_v5  ;;  %v1567_v35 = vld [vmem:[#allocation3 + $0xe8] sm:$0xff] }
 0x2c3   : > { %v2002_v38 = vpop.f32.mrf.mxu3 }
 0x2c4   : > { %2426 = vst.msk [vmem:[%s3449_s29 + $0xc8] sm:$0xff] %vm902_vm3, %v2394_v22  ;;  %v2003_v19 = vadd.f32 %v2002_v38, %v1862_v9  ;;  %v2264_v21 = vld [vmem:[#allocation3 + $0xd8] sm:$0xff] }
 0x2c5   : > { %1630 = vst.msk [vmem:[#allocation3 + $0xe0] sm:$0xff] %vm902_vm3, %v1598_v57 }
 0x2c6   : > { %v2232_v43 = vadd.f32 %v2192_v51, %v2003_v19 }
 0x2c7   : > { %v1498_v24 = vpop.f32.mrf.mxu1 }
 0x2c8   : > { %v2296_v4 = vadd.f32 %v2264_v21, %v2232_v43  ;;  %v2195_v46 = vpop.f32.mrf.mxu0  ;;  %v1865_v55 = vpop.f32.mrf.mxu2  ;;  %v1535_v3 = vadd.f32 %v1498_v24, %v3404_v54 }
 0x2c9   : > { %v2359_v17 = vld [vmem:[#allocation3 + $0xd0] sm:$0xff] }
 0x2ca   : > { %v2395_v47 = vadd.f32 %v2729_v33, %v2359_v17  ;;  %2328 = vst.msk [vmem:[#allocation3 + $0xd8] sm:$0xff] %vm902_vm3, %v2296_v4  ;;  %v1599_v42 = vadd.f32 %v1567_v35, %v1535_v3 }
 0x2cb   : > { %v2005_v31 = vpop.f32.mrf.mxu3 }
 0x2cc   : > { %2427 = vst.msk [vmem:[%s3449_s29 + $0xd0] sm:$0xff] %vm902_vm3, %v2395_v47  ;;  %v2006_v12 = vadd.f32 %v2005_v31, %v1865_v55  ;;  %v2265_v32 = vld [vmem:[#allocation3 + $0xe0] sm:$0xff] }
 0x2cd   : > { %1631 = vst.msk [vmem:[#allocation3 + $0xe8] sm:$0xff] %vm902_vm3, %v1599_v42 }
 0x2ce   : > { %v2233_v37 = vadd.f32 %v2195_v46, %v2006_v12 }
 0x2cf   : > { %v1501_v54 = vpop.f32.mrf.mxu1 }
 0x2d0   : > { %v2297_v15 = vadd.f32 %v2265_v32, %v2233_v37  ;;  %v1867_v41 = vpop.f32.mrf.mxu2  ;;  %v1536_v7 = vadd.f32 %v1501_v54, %v3413_v14  ;;  %v2197_v11 = vpop.f32.mrf.mxu0 }
 0x2d1   : > { %v2360_v2 = vld [vmem:[#allocation3 + $0xd8] sm:$0xff] }
 0x2d2   : > { %v2396_v53 = vadd.f32 %v2729_v33, %v2360_v2  ;;  %2329 = vst.msk [vmem:[#allocation3 + $0xe0] sm:$0xff] %vm902_vm3, %v2297_v15  ;;  %v1600_v0 = vadd.f32 %v1568_v48, %v1536_v7 }
 0x2d3   : > { %v2007_v13 = vpop.f32.mrf.mxu3 }
 0x2d4   : > { %2428 = vst.msk [vmem:[%s3449_s29 + $0xd8] sm:$0xff] %vm902_vm3, %v2396_v53  ;;  %v2008_v44 = vadd.f32 %v2007_v13, %v1867_v41  ;;  %v2266_v49 = vld [vmem:[#allocation3 + $0xe8] sm:$0xff] }
 0x2d5   : > { %1632 = vst.msk [vmem:[#allocation3 + $0xf0] sm:$0xff] %vm902_vm3, %v1600_v0 }
 0x2d6   : > { %v2234_v1 = vadd.f32 %v2197_v11, %v2008_v44 }
 0x2d7   : > { %v1503_v62 = vpop.f32.mrf.mxu1 }
 0x2d8   : > { %v2298_v30 = vadd.f32 %v2266_v49, %v2234_v1  ;;  %v1870_v52 = vpop.f32.mrf.mxu2  ;;  %v1537_v14 = vadd.f32 %v1503_v62, %v3420_v58  ;;  %v2200_v40 = vpop.f32.mrf.mxu0 }
 0x2d9   : > { %v2361_v25 = vld [vmem:[#allocation3 + $0xe0] sm:$0xff] }
 0x2da   : > { %v2397_v60 = vadd.f32 %v2729_v33, %v2361_v25  ;;  %2330 = vst.msk [vmem:[#allocation3 + $0xe8] sm:$0xff] %vm902_vm3, %v2298_v30  ;;  %v1601_v39 = vadd.f32 %v1569_v8, %v1537_v14 }
 0x2db   : > { %v2010_v45 = vpop.f32.mrf.mxu3 }
 0x2dc   : > { %2429 = vst.msk [vmem:[%s3449_s29 + $0xe0] sm:$0xff] %vm902_vm3, %v2397_v60  ;;  %v2011_v18 = vadd.f32 %v2010_v45, %v1870_v52  ;;  %v2267_v6 = vld [vmem:[#allocation3 + $0xf0] sm:$0xff] }
 0x2dd   : > { %1633 = vst.msk [vmem:[#allocation3 + $0xf8] sm:$0xff] %vm902_vm3, %v1601_v39 }
 0x2de   : > { %v2235_v56 = vadd.f32 %v2200_v40, %v2011_v18 }
 0x2e0   : > { %v2299_v29 = vadd.f32 %v2267_v6, %v2235_v56  ;;  %v1872_v58 = vpop.f32.mrf.mxu2  ;;  %v2202_v50 = vpop.f32.mrf.mxu0 }
 0x2e1   : > { %v2362_v27 = vld [vmem:[#allocation3 + $0xe8] sm:$0xff] }
 0x2e2   : > { %v2398_v16 = vadd.f32 %v2729_v33, %v2362_v27  ;;  %2331 = vst.msk [vmem:[#allocation3 + $0xf0] sm:$0xff] %vm902_vm3, %v2299_v29 }
 0x2e3   : > { %v2012_v34 = vpop.f32.mrf.mxu3 }
 0x2e4   : > { %2430 = vst.msk [vmem:[%s3449_s29 + $0xe8] sm:$0xff] %vm902_vm3, %v2398_v16  ;;  %v2013_v20 = vadd.f32 %v2012_v34, %v1872_v58  ;;  %v2268_v23 = vld [vmem:[#allocation3 + $0xf8] sm:$0xff] }
 0x2e6   : > { %v2236_v63 = vadd.f32 %v2202_v50, %v2013_v20 }
 0x2e8   : > { %v2300_v36 = vadd.f32 %v2268_v23, %v2236_v63 }
 0x2e9   : > { %v2363_v28 = vld [vmem:[#allocation3 + $0xf0] sm:$0xff] }
 0x2ea   : > { %v2399_v61 = vadd.f32 %v2729_v33, %v2363_v28  ;;  %2332 = vst.msk [vmem:[#allocation3 + $0xf8] sm:$0xff] %vm902_vm3, %v2300_v36 }
 0x2ec   : > { %2431 = vst.msk [vmem:[%s3449_s29 + $0xf0] sm:$0xff] %vm902_vm3, %v2399_v61 }
 0x2f1   : > { %v2364_v10 = vld [vmem:[#allocation3 + $0xf8] sm:$0xff] }
 0x2f2   : > { %v2400_v51 = vadd.f32 %v2729_v33, %v2364_v10 }
 0x2f4   : > { %2432 = vst.msk [vmem:[%s3449_s29 + $0xf8] sm:$0xff] %vm902_vm3, %v2400_v51 }
 0x2f5 PF: > { %s13_s16 = sadd.s32 1, %s2768_s16   ;;  %s3719_s12 = smov %s2760_s14 }
 0x2f6   : > { %p10_p7 = scmp.ge.s32.totalorder %s13_s16, 10   ;;  %s3720_s13 = smov %s2764_s15 }
 0x2f7   : > { %s3721_s14 = smov %s3724_s17  ;;  %s3722_s15 = smov %s3728_s18 }
 0x2f8   :  { %12 = sbr.rel (!%p10_p7) target bundleno = 3 (0x3), region = 73 }

</bundles_post_ra>
